<compile_context>
chip_gen: v7x
topology: tpu7x:2x2x1
jax: 0.10.0
libtpu: 0.0.40
codegen_flags: <defaults>
</compile_context>

<pallas_src>
import jax
import jax.numpy as jnp
import numpy as np
from jax import lax
from jax.experimental import pallas as pl
from jax.experimental.pallas import tpu as pltpu

# ---------------- small synthetic configuration ----------------
IMG_H, IMG_W = 32, 32          # config.DATA.HEIGHT / WIDTH (small)
PATCH = 16                     # patch size / stride of conv_proj
IN_CH = 3                      # RGB
EMBED_DIM = 128                # config.MODEL.CA_DIM (small)
NUM_HEADS = 4
HEAD_DIM = EMBED_DIM // NUM_HEADS
MLP_DIM = 4 * EMBED_DIM
DEPTH = 2                      # small stack of ViT blocks
NUM_CLS = 2                    # num_cls_token=2 (id + cloth tokens)
N_PATCH = (IMG_H // PATCH) * (IMG_W // PATCH)
SEQ = N_PATCH + NUM_CLS
LN_EPS = 1e-6                  # timm ViT LayerNorm eps
BN_EPS = 1e-5                  # nn.BatchNorm1d default eps

# All Python floats (never captured jnp constants).
ATTN_SCALE = float(HEAD_DIM) ** -0.5
BN_INV = float((1.0 + BN_EPS) ** -0.5)   # BatchNorm1d eval: mean=0, var=1
GELU_C = 0.7978845608028654              # sqrt(2/pi)

# contraction of the LAST dims of both operands (q @ k^T without a transpose)
_NT_DIMS = (((1,), (1,)), ((), ()))


# ---------------- in-kernel helpers (all f32) ----------------
def _layer_norm(v, w, b, eps=LN_EPS):
    mu = jnp.mean(v, axis=-1, keepdims=True)
    var = jnp.mean(jnp.square(v - mu), axis=-1, keepdims=True)
    return (v - mu) * jax.lax.rsqrt(var + eps) * w + b


def _gelu(v):
    # TODO(synk): PyTorch nn.GELU uses exact erf; tanh approximation used here
    # (tanh goes to the EUP; erf lowering is not guaranteed in Mosaic).
    return 0.5 * v * (1.0 + jnp.tanh(GELU_C * (v + 0.044715 * v * v * v)))


# ---------------- BlockSpec helpers ----------------
def _const_spec(shape):
    """Whole-array block, DMA'd once (constant block index across the grid)."""
    nd = len(shape)
    return pl.BlockSpec(tuple(shape), lambda k, _n=nd: (0,) * _n)


def _blk_spec(shape):
    """Per-depth weight slab: leading DEPTH axis indexed by the grid step
    (auto double-buffered by the pipeline), squeezed inside the kernel."""
    nd = len(shape)
    return pl.BlockSpec((None,) + tuple(shape[1:]),
                        lambda k, _n=nd: (k,) + (0,) * (_n - 1))


# ---------------- the fused kernel ----------------
def _make_kernel(B):
    D = EMBED_DIM
    S = SEQ
    NP = N_PATCH
    BS = B * S
    HD = HEAD_DIM

    def kernel(patches, conv_w, conv_b, cls_tok, pos_emb, neg_bias,
               norm_w, norm_b, bnid_w, bnid_b, bncl_w, bncl_b,
               ln1w, ln1b, qkvw, qkvb, projw, projb,
               ln2w, ln2b, fc1w, fc1b, fc2w, fc2b,
               all_ref, id_ref, cl_ref, seq_ref, ho_ref):
        step = pl.program_id(0)

        # ---- prologue: conv_proj (as matmul) + cls tokens + pos_embed ------
        @pl.when(step == 0)
        def _prologue():
            tok = (jnp.dot(patches[...], conv_w[...],
                           preferred_element_type=jnp.float32)
                   + conv_b[...])                                # (B*NP, D) f32
            pos = pos_emb[...]                                   # (S, D)
            cls_rows = cls_tok[...] + pos[:NUM_CLS, :]           # (NUM_CLS, D)
            pos_patch = pos[NUM_CLS:, :]                         # (NP, D)
            for b in range(B):                                   # static, B tiny
                base = b * S
                seq_ref[base:base + NUM_CLS, :] = cls_rows
                seq_ref[base + NUM_CLS:base + S, :] = (
                    tok[b * NP:(b + 1) * NP, :] + pos_patch)

        # ---- one transformer block (every grid step) -----------------------
        # NOTE: seq_ref is a scratch written by the step-0 prologue above;
        # this read must stay AFTER the prologue in program order.
        x = seq_ref[...]                                         # (B*S, D) f32

        # attention: LN -> fused QKV -> per-head scores with the precomputed
        # block-diagonal batch bias -> AV into lane slices of ho_ref -> one
        # merged output projection matmul.
        h = _layer_norm(x, ln1w[...], ln1b[...])
        qkv = (jnp.dot(h.astype(jnp.bfloat16), qkvw[...],
                       preferred_element_type=jnp.float32) + qkvb[...])
        q = qkv[:, :D]
        km = qkv[:, D:2 * D]
        vm = qkv[:, 2 * D:]
        bias = neg_bias[...]                                     # (BS, BS) f32

        # TODO(synk): heads could additionally be stacked along sublanes
        # (8 MXU pushes -> 2); skipped pending measurement of restack cost.
        for hi in range(NUM_HEADS):                              # static unroll
            sl = slice(hi * HD, (hi + 1) * HD)
            qh, kh, vh = q[:, sl], km[:, sl], vm[:, sl]          # (BS, HD)
            s = lax.dot_general(qh, kh, _NT_DIMS,
                                preferred_element_type=jnp.float32)
            s = s * ATTN_SCALE + bias
            s = s - jnp.max(s, axis=-1, keepdims=True)
            p = jnp.exp(s)
            a = p * pl.reciprocal(jnp.sum(p, axis=-1, keepdims=True),
                                  approx=True)
            ho_ref[:, sl] = jnp.dot(a, vh,
                                    preferred_element_type=jnp.float32)

        attn = (jnp.dot(ho_ref[...].astype(jnp.bfloat16), projw[...],
                        preferred_element_type=jnp.float32) + projb[...])
        x = x + attn                                             # residual 1

        # MLP: LN -> fc1 -> GELU -> fc2
        h2 = _layer_norm(x, ln2w[...], ln2b[...])
        h2 = (jnp.dot(h2.astype(jnp.bfloat16), fc1w[...],
                      preferred_element_type=jnp.float32) + fc1b[...])
        h2 = _gelu(h2)
        h2 = (jnp.dot(h2.astype(jnp.bfloat16), fc2w[...],
                      preferred_element_type=jnp.float32) + fc2b[...])
        x = x + h2                                               # residual 2
        seq_ref[...] = x

        # ---- epilogue: final LN + BatchNorm heads (last block only) --------
        @pl.when(step == pl.num_programs(0) - 1)
        def _epilogue():
            id_rows = seq_ref[0::S, :]                           # rows 0, S, ... -> (B, D)
            cl_rows = seq_ref[1::S, :]                           # rows 1, S+1, ... -> (B, D)
            # BatchNorm1d eval mode: running_mean = 0, running_var = 1.
            # TODO(synk): fold real running statistics here when loading a
            #             trained checkpoint (they are not 0/1 after training).
            y_id = (_layer_norm(id_rows, norm_w[...], norm_b[...])
                    * BN_INV * bnid_w[...] + bnid_b[...])
            y_cl = (_layer_norm(cl_rows, norm_w[...], norm_b[...])
                    * BN_INV * bncl_w[...] + bncl_b[...])
            id_ref[...] = y_id
            cl_ref[...] = y_cl
            all_ref[:, :D] = y_id                                # lane-aligned
            all_ref[:, D:] = y_cl

    return kernel


# ---------------- full forward (im2col glue in plain JAX) ----------------
def vitca_forward(x, params):
    B, C, H, W = x.shape
    assert (H, W) == (IMG_H, IMG_W), "input image size must match the model"
    hh, ww = H // PATCH, W // PATCH
    D = EMBED_DIM
    BS = B * SEQ

    # im2col: non-overlapping 16x16 patches flattened in (c, ky, kx) order
    # (matches how the PyTorch stride-16 conv contracts its weight).
    patches = x.reshape(B, C, hh, PATCH, ww, PATCH)
    patches = patches.transpose(0, 2, 4, 1, 3, 5).reshape(
        B * hh * ww, C * PATCH * PATCH).astype(jnp.bfloat16)

    # Static block-diagonal "same batch" additive bias (0 / -1e30), built once
    # on the host and fed as a tiny constant input (BS*BS*4 bytes).
    rb = np.arange(BS) // SEQ
    neg_bias = jnp.asarray(
        np.where(rb[:, None] == rb[None, :], 0.0, -1e30), dtype=jnp.float32)

    args = (patches,
            params['conv_w'], params['conv_b'],
            params['cls_token'], params['pos_embed'],
            neg_bias,
            params['norm_w'], params['norm_b'],
            params['bn_id_w'], params['bn_id_b'],
            params['bn_cloth_w'], params['bn_cloth_b'],
            params['ln1_w'], params['ln1_b'],
            params['qkv_w'], params['qkv_b'],
            params['proj_w'], params['proj_b'],
            params['ln2_w'], params['ln2_b'],
            params['fc1_w'], params['fc1_b'],
            params['fc2_w'], params['fc2_b'])

    n_const = 12
    in_specs = ([_const_spec(a.shape) for a in args[:n_const]] +
                [_blk_spec(a.shape) for a in args[n_const:]])

    out_shape = (jax.ShapeDtypeStruct((B, 2 * D), jnp.float32),
                 jax.ShapeDtypeStruct((B, D), jnp.float32),
                 jax.ShapeDtypeStruct((B, D), jnp.float32))
    out_specs = (_const_spec((B, 2 * D)),
                 _const_spec((B, D)),
                 _const_spec((B, D)))

    # TODO(synk): on v7x a leading CORE_PARALLEL batch axis (one batch per
    #             TensorCore, per-core seq scratch, no batch mask) would use
    #             both cores; kept single-core here since v5e/v6e have 1 TC
    #             and B=2 is tiny.
    return pl.pallas_call(
        _make_kernel(B),
        grid=(DEPTH,),
        in_specs=in_specs,
        out_specs=out_specs,
        out_shape=out_shape,
        scratch_shapes=[pltpu.VMEM((BS, D), jnp.float32),   # resident tokens
                        pltpu.VMEM((BS, D), jnp.float32)],  # merged head outs
        compiler_params=pltpu.CompilerParams(
            dimension_semantics=("arbitrary",)),
    )(*args)


# ---------------- deterministic synthetic parameters ----------------
def init_params(key):
    def nrm(k, shape, std=0.02):
        return std * jax.random.normal(k, shape, jnp.float32)

    ks = list(jax.random.split(key, 9))
    p = {}
    # conv_proj weight: PyTorch (D, C, 16, 16), stored flattened to
    # (C*16*16, D); matmul weights kept in bf16 (f32 accumulation in-kernel).
    p['conv_w'] = nrm(ks[0], (IN_CH * PATCH * PATCH, EMBED_DIM)).astype(jnp.bfloat16)
    p['conv_b'] = jnp.zeros((1, EMBED_DIM), jnp.float32)
    p['cls_token'] = nrm(ks[1], (NUM_CLS, EMBED_DIM))
    p['pos_embed'] = nrm(ks[2], (SEQ, EMBED_DIM))
    # per-block weights stacked on a leading DEPTH axis
    p['ln1_w'] = jnp.ones((DEPTH, 1, EMBED_DIM), jnp.float32)
    p['ln1_b'] = jnp.zeros((DEPTH, 1, EMBED_DIM), jnp.float32)
    p['qkv_w'] = nrm(ks[3], (DEPTH, EMBED_DIM, 3 * EMBED_DIM)).astype(jnp.bfloat16)
    p['qkv_b'] = jnp.zeros((DEPTH, 1, 3 * EMBED_DIM), jnp.float32)
    p['proj_w'] = nrm(ks[4], (DEPTH, EMBED_DIM, EMBED_DIM)).astype(jnp.bfloat16)
    p['proj_b'] = jnp.zeros((DEPTH, 1, EMBED_DIM), jnp.float32)
    p['ln2_w'] = jnp.ones((DEPTH, 1, EMBED_DIM), jnp.float32)
    p['ln2_b'] = jnp.zeros((DEPTH, 1, EMBED_DIM), jnp.float32)
    p['fc1_w'] = nrm(ks[5], (DEPTH, EMBED_DIM, MLP_DIM)).astype(jnp.bfloat16)
    p['fc1_b'] = jnp.zeros((DEPTH, 1, MLP_DIM), jnp.float32)
    p['fc2_w'] = nrm(ks[6], (DEPTH, MLP_DIM, EMBED_DIM)).astype(jnp.bfloat16)
    p['fc2_b'] = jnp.zeros((DEPTH, 1, EMBED_DIM), jnp.float32)
    # final norm + BN heads
    p['norm_w'] = jnp.ones((1, EMBED_DIM), jnp.float32)
    p['norm_b'] = jnp.zeros((1, EMBED_DIM), jnp.float32)
    # init.normal_(weight, 1.0, 0.02), init.constant_(bias, 0.0)
    p['bn_id_w'] = 1.0 + nrm(ks[7], (1, EMBED_DIM))
    p['bn_id_b'] = jnp.zeros((1, EMBED_DIM), jnp.float32)
    p['bn_cloth_w'] = 1.0 + nrm(ks[8], (1, EMBED_DIM))
    p['bn_cloth_b'] = jnp.zeros((1, EMBED_DIM), jnp.float32)
    return p


if __name__ == "__main__":
    key = jax.random.PRNGKey(0)
    kx, kp = jax.random.split(key)
    x = jax.random.normal(kx, (2, IN_CH, IMG_H, IMG_W), jnp.float32)   # NCHW
    params = init_params(kp)

    # TODO(synk): PatchShuffle branch (train=True & PATCH_SHUFFLE) not
    #             implemented; this is the eval forward(train=False) path,
    #             where all dropout layers are identity.
    fwd = jax.jit(vitca_forward)
    x_all, x_id, x_cloth = fwd(x, params)
    jax.block_until_ready((x_all, x_id, x_cloth))

    assert x_all.shape == (2, 2 * EMBED_DIM)
    assert x_id.shape == (2, EMBED_DIM)
    assert x_cloth.shape == (2, EMBED_DIM)
    assert bool(jnp.all(jnp.isfinite(x_all)))
    print("KERNEL_OK")
</pallas_src>

<mosaic_0001>
module attributes {stable_mosaic.version = 11 : i64} {
  func.func @kernel(%arg0: i32, %arg1: memref<8x768xbf16, #tpu.memory_space<vmem>>, %arg2: memref<768x128xbf16, #tpu.memory_space<vmem>>, %arg3: memref<1x128xf32, #tpu.memory_space<vmem>>, %arg4: memref<2x128xf32, #tpu.memory_space<vmem>>, %arg5: memref<6x128xf32, #tpu.memory_space<vmem>>, %arg6: memref<12x12xf32, #tpu.memory_space<vmem>>, %arg7: memref<1x128xf32, #tpu.memory_space<vmem>>, %arg8: memref<1x128xf32, #tpu.memory_space<vmem>>, %arg9: memref<1x128xf32, #tpu.memory_space<vmem>>, %arg10: memref<1x128xf32, #tpu.memory_space<vmem>>, %arg11: memref<1x128xf32, #tpu.memory_space<vmem>>, %arg12: memref<1x128xf32, #tpu.memory_space<vmem>>, %arg13: memref<1x1x128xf32, #tpu.memory_space<vmem>>, %arg14: memref<1x1x128xf32, #tpu.memory_space<vmem>>, %arg15: memref<1x128x384xbf16, #tpu.memory_space<vmem>>, %arg16: memref<1x1x384xf32, #tpu.memory_space<vmem>>, %arg17: memref<1x128x128xbf16, #tpu.memory_space<vmem>>, %arg18: memref<1x1x128xf32, #tpu.memory_space<vmem>>, %arg19: memref<1x1x128xf32, #tpu.memory_space<vmem>>, %arg20: memref<1x1x128xf32, #tpu.memory_space<vmem>>, %arg21: memref<1x128x512xbf16, #tpu.memory_space<vmem>>, %arg22: memref<1x1x512xf32, #tpu.memory_space<vmem>>, %arg23: memref<1x512x128xbf16, #tpu.memory_space<vmem>>, %arg24: memref<1x1x128xf32, #tpu.memory_space<vmem>>, %arg25: memref<2x256xf32, #tpu.memory_space<vmem>>, %arg26: memref<2x128xf32, #tpu.memory_space<vmem>>, %arg27: memref<2x128xf32, #tpu.memory_space<vmem>>, %arg28: memref<12x128xf32, #tpu.memory_space<vmem>>, %arg29: memref<12x128xf32, #tpu.memory_space<vmem>>) attributes {dimension_semantics = [#tpu.dimension_semantics<arbitrary>], iteration_bounds = array<i64: 2>, scalar_prefetch = 0 : i64, scratch_operands = 2 : i64, tpu.core_type = #tpu.core_type<tc>, window_params = [{pipeline_mode = #tpu.pipeline_mode<synchronous>, transform_indices = @transform_0, window_bounds = array<i64: 8, 768>}, {pipeline_mode = #tpu.pipeline_mode<synchronous>, transform_indices = @transform_1, window_bounds = array<i64: 768, 128>}, {pipeline_mode = #tpu.pipeline_mode<synchronous>, transform_indices = @transform_2, window_bounds = array<i64: 1, 128>}, {pipeline_mode = #tpu.pipeline_mode<synchronous>, transform_indices = @transform_3, window_bounds = array<i64: 2, 128>}, {pipeline_mode = #tpu.pipeline_mode<synchronous>, transform_indices = @transform_4, window_bounds = array<i64: 6, 128>}, {pipeline_mode = #tpu.pipeline_mode<synchronous>, transform_indices = @transform_5, window_bounds = array<i64: 12, 12>}, {pipeline_mode = #tpu.pipeline_mode<synchronous>, transform_indices = @transform_6, window_bounds = array<i64: 1, 128>}, {pipeline_mode = #tpu.pipeline_mode<synchronous>, transform_indices = @transform_7, window_bounds = array<i64: 1, 128>}, {pipeline_mode = #tpu.pipeline_mode<synchronous>, transform_indices = @transform_8, window_bounds = array<i64: 1, 128>}, {pipeline_mode = #tpu.pipeline_mode<synchronous>, transform_indices = @transform_9, window_bounds = array<i64: 1, 128>}, {pipeline_mode = #tpu.pipeline_mode<synchronous>, transform_indices = @transform_10, window_bounds = array<i64: 1, 128>}, {pipeline_mode = #tpu.pipeline_mode<synchronous>, transform_indices = @transform_11, window_bounds = array<i64: 1, 128>}, {transform_indices = @transform_12, window_bounds = array<i64: 1, 1, 128>}, {transform_indices = @transform_13, window_bounds = array<i64: 1, 1, 128>}, {transform_indices = @transform_14, window_bounds = array<i64: 1, 128, 384>}, {transform_indices = @transform_15, window_bounds = array<i64: 1, 1, 384>}, {transform_indices = @transform_16, window_bounds = array<i64: 1, 128, 128>}, {transform_indices = @transform_17, window_bounds = array<i64: 1, 1, 128>}, {transform_indices = @transform_18, window_bounds = array<i64: 1, 1, 128>}, {transform_indices = @transform_19, window_bounds = array<i64: 1, 1, 128>}, {transform_indices = @transform_20, window_bounds = array<i64: 1, 128, 512>}, {transform_indices = @transform_21, window_bounds = array<i64: 1, 1, 512>}, {transform_indices = @transform_22, window_bounds = array<i64: 1, 512, 128>}, {transform_indices = @transform_23, window_bounds = array<i64: 1, 1, 128>}, {pipeline_mode = #tpu.pipeline_mode<synchronous>, transform_indices = @transform_24, window_bounds = array<i64: 2, 256>}, {pipeline_mode = #tpu.pipeline_mode<synchronous>, transform_indices = @transform_25, window_bounds = array<i64: 2, 128>}, {pipeline_mode = #tpu.pipeline_mode<synchronous>, transform_indices = @transform_26, window_bounds = array<i64: 2, 128>}]} {
    %c0_i32 = arith.constant 0 : i32
    %0 = arith.cmpi eq, %arg0, %c0_i32 : i32
    %1 = arith.extui %0 : i1 to i32
    %c0_i32_0 = arith.constant 0 : i32
    %2 = arith.cmpi ne, %1, %c0_i32_0 : i32
    scf.if %2 {
      %c0_87 = arith.constant 0 : index
      %c0_88 = arith.constant 0 : index
      %188 = vector.load %arg1[%c0_87, %c0_88] : memref<8x768xbf16, #tpu.memory_space<vmem>>, vector<8x768xbf16>
      %c0_89 = arith.constant 0 : index
      %c0_90 = arith.constant 0 : index
      %189 = vector.load %arg2[%c0_89, %c0_90] : memref<768x128xbf16, #tpu.memory_space<vmem>>, vector<768x128xbf16>
      %cst_91 = arith.constant dense<0.000000e+00> : vector<8x128xf32>
      %190 = tpu.matmul %188, %189, %cst_91 {dimension_numbers = #tpu.dot_dimension_numbers<[1], [0], [0], [1], [0, 0, 1, 1], [], []>} : vector<8x768xbf16>, vector<768x128xbf16>, vector<8x128xf32> -> vector<8x128xf32>
      %c0_92 = arith.constant 0 : index
      %c0_93 = arith.constant 0 : index
      %191 = vector.load %arg3[%c0_92, %c0_93] : memref<1x128xf32, #tpu.memory_space<vmem>>, vector<1x128xf32>
      %192 = vector.broadcast %191 : vector<1x128xf32> to vector<8x128xf32>
      %193 = arith.addf %190, %192 : vector<8x128xf32>
      %c0_94 = arith.constant 0 : index
      %c0_95 = arith.constant 0 : index
      %194 = vector.load %arg5[%c0_94, %c0_95] : memref<6x128xf32, #tpu.memory_space<vmem>>, vector<6x128xf32>
      %c0_96 = arith.constant 0 : index
      %c0_97 = arith.constant 0 : index
      %195 = vector.load %arg4[%c0_96, %c0_97] : memref<2x128xf32, #tpu.memory_space<vmem>>, vector<2x128xf32>
      %196 = vector.extract_strided_slice %194 {offsets = [0, 0], sizes = [2, 128], strides = [1, 1]} : vector<6x128xf32> to vector<2x128xf32>
      %197 = arith.addf %195, %196 : vector<2x128xf32>
      %198 = vector.extract_strided_slice %194 {offsets = [2, 0], sizes = [4, 128], strides = [1, 1]} : vector<6x128xf32> to vector<4x128xf32>
      %c0_98 = arith.constant 0 : index
      %c0_99 = arith.constant 0 : index
      %199 = vector.load %arg28[%c0_98, %c0_99] : memref<12x128xf32, #tpu.memory_space<vmem>>, vector<2x128xf32>
      tpu.vector_store %arg28[%c0_98, %c0_99], %197 {strides = array<i32>} : memref<12x128xf32, #tpu.memory_space<vmem>>, vector<2x128xf32>,
      %200 = vector.extract_strided_slice %193 {offsets = [0, 0], sizes = [4, 128], strides = [1, 1]} : vector<8x128xf32> to vector<4x128xf32>
      %201 = arith.addf %200, %198 : vector<4x128xf32>
      %c2 = arith.constant 2 : index
      %c0_100 = arith.constant 0 : index
      %202 = vector.load %arg28[%c2, %c0_100] : memref<12x128xf32, #tpu.memory_space<vmem>>, vector<4x128xf32>
      tpu.vector_store %arg28[%c2, %c0_100], %201 {strides = array<i32>} : memref<12x128xf32, #tpu.memory_space<vmem>>, vector<4x128xf32>,
      %c6 = arith.constant 6 : index
      %c0_101 = arith.constant 0 : index
      %203 = vector.load %arg28[%c6, %c0_101] : memref<12x128xf32, #tpu.memory_space<vmem>>, vector<2x128xf32>
      tpu.vector_store %arg28[%c6, %c0_101], %197 {strides = array<i32>} : memref<12x128xf32, #tpu.memory_space<vmem>>, vector<2x128xf32>,
      %204 = vector.extract_strided_slice %193 {offsets = [4, 0], sizes = [4, 128], strides = [1, 1]} : vector<8x128xf32> to vector<4x128xf32>
      %205 = arith.addf %204, %198 : vector<4x128xf32>
      %c8 = arith.constant 8 : index
      %c0_102 = arith.constant 0 : index
      %206 = vector.load %arg28[%c8, %c0_102] : memref<12x128xf32, #tpu.memory_space<vmem>>, vector<4x128xf32>
      tpu.vector_store %arg28[%c8, %c0_102], %205 {strides = array<i32>} : memref<12x128xf32, #tpu.memory_space<vmem>>, vector<4x128xf32>,
    } else {
    }
    %c0 = arith.constant 0 : index
    %c0_1 = arith.constant 0 : index
    %3 = vector.load %arg28[%c0, %c0_1] : memref<12x128xf32, #tpu.memory_space<vmem>>, vector<12x128xf32>
    %c0_2 = arith.constant 0 : index
    %c0_3 = arith.constant 0 : index
    %c0_4 = arith.constant 0 : index
    %4 = vector.load %arg13[%c0_2, %c0_3, %c0_4] : memref<1x1x128xf32, #tpu.memory_space<vmem>>, vector<1x1x128xf32>
    %5 = vector.shape_cast %4 : vector<1x1x128xf32> to vector<1x128xf32>
    %c0_5 = arith.constant 0 : index
    %c0_6 = arith.constant 0 : index
    %c0_7 = arith.constant 0 : index
    %6 = vector.load %arg14[%c0_5, %c0_6, %c0_7] : memref<1x1x128xf32, #tpu.memory_space<vmem>>, vector<1x1x128xf32>
    %7 = vector.shape_cast %6 : vector<1x1x128xf32> to vector<1x128xf32>
    %cst = arith.constant dense<0.000000e+00> : vector<12xf32>
    %8 = vector.multi_reduction <add>, %3, %cst [1] : vector<12x128xf32> to vector<12xf32>
    %9 = vector.shape_cast %8 : vector<12xf32> to vector<12x1xf32>
    %cst_8 = arith.constant 1.280000e+02 : f32
    %10 = vector.broadcast %cst_8 : f32 to vector<12x1xf32>
    %11 = arith.divf %9, %10 : vector<12x1xf32>
    %12 = vector.broadcast %11 : vector<12x1xf32> to vector<12x128xf32>
    %13 = arith.subf %3, %12 : vector<12x128xf32>
    %14 = arith.mulf %13, %13 : vector<12x128xf32>
    %cst_9 = arith.constant dense<0.000000e+00> : vector<12xf32>
    %15 = vector.multi_reduction <add>, %14, %cst_9 [1] : vector<12x128xf32> to vector<12xf32>
    %16 = vector.shape_cast %15 : vector<12xf32> to vector<12x1xf32>
    %cst_10 = arith.constant 1.280000e+02 : f32
    %17 = vector.broadcast %cst_10 : f32 to vector<12x1xf32>
    %18 = arith.divf %16, %17 : vector<12x1xf32>
    %19 = vector.broadcast %11 : vector<12x1xf32> to vector<12x128xf32>
    %20 = arith.subf %3, %19 : vector<12x128xf32>
    %cst_11 = arith.constant 9.99999997E-7 : f32
    %21 = vector.broadcast %cst_11 : f32 to vector<12x1xf32>
    %22 = arith.addf %18, %21 : vector<12x1xf32>
    %23 = math.rsqrt %22 : vector<12x1xf32>
    %24 = vector.broadcast %23 : vector<12x1xf32> to vector<12x128xf32>
    %25 = arith.mulf %20, %24 : vector<12x128xf32>
    %26 = vector.broadcast %5 : vector<1x128xf32> to vector<12x128xf32>
    %27 = arith.mulf %25, %26 : vector<12x128xf32>
    %28 = vector.broadcast %7 : vector<1x128xf32> to vector<12x128xf32>
    %29 = arith.addf %27, %28 : vector<12x128xf32>
    %30 = arith.truncf %29 : vector<12x128xf32> to vector<12x128xbf16>
    %c0_12 = arith.constant 0 : index
    %c0_13 = arith.constant 0 : index
    %c0_14 = arith.constant 0 : index
    %31 = vector.load %arg15[%c0_12, %c0_13, %c0_14] : memref<1x128x384xbf16, #tpu.memory_space<vmem>>, vector<1x128x384xbf16>
    %32 = vector.shape_cast %31 : vector<1x128x384xbf16> to vector<128x384xbf16>
    %cst_15 = arith.constant dense<0.000000e+00> : vector<12x384xf32>
    %33 = tpu.matmul %30, %32, %cst_15 {dimension_numbers = #tpu.dot_dimension_numbers<[1], [0], [0], [1], [0, 0, 1, 1], [], []>} : vector<12x128xbf16>, vector<128x384xbf16>, vector<12x384xf32> -> vector<12x384xf32>
    %c0_16 = arith.constant 0 : index
    %c0_17 = arith.constant 0 : index
    %c0_18 = arith.constant 0 : index
    %34 = vector.load %arg16[%c0_16, %c0_17, %c0_18] : memref<1x1x384xf32, #tpu.memory_space<vmem>>, vector<1x1x384xf32>
    %35 = vector.shape_cast %34 : vector<1x1x384xf32> to vector<1x384xf32>
    %36 = vector.broadcast %35 : vector<1x384xf32> to vector<12x384xf32>
    %37 = arith.addf %33, %36 : vector<12x384xf32>
    %38 = vector.extract_strided_slice %37 {offsets = [0, 0], sizes = [12, 128], strides = [1, 1]} : vector<12x384xf32> to vector<12x128xf32>
    %39 = vector.extract_strided_slice %37 {offsets = [0, 128], sizes = [12, 128], strides = [1, 1]} : vector<12x384xf32> to vector<12x128xf32>
    %40 = vector.extract_strided_slice %37 {offsets = [0, 256], sizes = [12, 128], strides = [1, 1]} : vector<12x384xf32> to vector<12x128xf32>
    %c0_19 = arith.constant 0 : index
    %c0_20 = arith.constant 0 : index
    %41 = vector.load %arg6[%c0_19, %c0_20] : memref<12x12xf32, #tpu.memory_space<vmem>>, vector<12x12xf32>
    %42 = vector.extract_strided_slice %38 {offsets = [0, 0], sizes = [12, 32], strides = [1, 1]} : vector<12x128xf32> to vector<12x32xf32>
    %43 = vector.extract_strided_slice %39 {offsets = [0, 0], sizes = [12, 32], strides = [1, 1]} : vector<12x128xf32> to vector<12x32xf32>
    %44 = vector.extract_strided_slice %40 {offsets = [0, 0], sizes = [12, 32], strides = [1, 1]} : vector<12x128xf32> to vector<12x32xf32>
    %cst_21 = arith.constant dense<0.000000e+00> : vector<12x12xf32>
    %45 = tpu.matmul %42, %43, %cst_21 {dimension_numbers = #tpu.dot_dimension_numbers<[1], [1], [0], [0], [0, 0, 1, 0], [], []>} : vector<12x32xf32>, vector<12x32xf32>, vector<12x12xf32> -> vector<12x12xf32>
    %cst_22 = arith.constant 0.176776692 : f32
    %46 = vector.broadcast %cst_22 : f32 to vector<12x12xf32>
    %47 = arith.mulf %45, %46 : vector<12x12xf32>
    %48 = arith.addf %47, %41 : vector<12x12xf32>
    %cst_23 = arith.constant dense<0xFF800000> : vector<12xf32>
    %49 = vector.multi_reduction <maximumf>, %48, %cst_23 [1] : vector<12x12xf32> to vector<12xf32>
    %50 = vector.shape_cast %49 : vector<12xf32> to vector<12x1xf32>
    %51 = vector.broadcast %50 : vector<12x1xf32> to vector<12x12xf32>
    %52 = arith.subf %48, %51 : vector<12x12xf32>
    %53 = math.exp %52 : vector<12x12xf32>
    %cst_24 = arith.constant dense<0.000000e+00> : vector<12xf32>
    %54 = vector.multi_reduction <add>, %53, %cst_24 [1] : vector<12x12xf32> to vector<12xf32>
    %55 = vector.shape_cast %54 : vector<12xf32> to vector<12x1xf32>
    %56 = tpu.reciprocal %55 {approx = true} : vector<12x1xf32> -> vector<12x1xf32>
    %57 = vector.broadcast %56 : vector<12x1xf32> to vector<12x12xf32>
    %58 = arith.mulf %53, %57 : vector<12x12xf32>
    %cst_25 = arith.constant dense<0.000000e+00> : vector<12x32xf32>
    %59 = tpu.matmul %58, %44, %cst_25 {dimension_numbers = #tpu.dot_dimension_numbers<[1], [0], [0], [1], [0, 0, 1, 1], [], []>} : vector<12x12xf32>, vector<12x32xf32>, vector<12x32xf32> -> vector<12x32xf32>
    %c0_26 = arith.constant 0 : index
    %c0_27 = arith.constant 0 : index
    %60 = vector.load %arg29[%c0_26, %c0_27] : memref<12x128xf32, #tpu.memory_space<vmem>>, vector<12x32xf32>
    tpu.vector_store %arg29[%c0_26, %c0_27], %59 {strides = array<i32>} : memref<12x128xf32, #tpu.memory_space<vmem>>, vector<12x32xf32>,
    %61 = vector.extract_strided_slice %38 {offsets = [0, 32], sizes = [12, 32], strides = [1, 1]} : vector<12x128xf32> to vector<12x32xf32>
    %62 = vector.extract_strided_slice %39 {offsets = [0, 32], sizes = [12, 32], strides = [1, 1]} : vector<12x128xf32> to vector<12x32xf32>
    %63 = vector.extract_strided_slice %40 {offsets = [0, 32], sizes = [12, 32], strides = [1, 1]} : vector<12x128xf32> to vector<12x32xf32>
    %cst_28 = arith.constant dense<0.000000e+00> : vector<12x12xf32>
    %64 = tpu.matmul %61, %62, %cst_28 {dimension_numbers = #tpu.dot_dimension_numbers<[1], [1], [0], [0], [0, 0, 1, 0], [], []>} : vector<12x32xf32>, vector<12x32xf32>, vector<12x12xf32> -> vector<12x12xf32>
    %cst_29 = arith.constant 0.176776692 : f32
    %65 = vector.broadcast %cst_29 : f32 to vector<12x12xf32>
    %66 = arith.mulf %64, %65 : vector<12x12xf32>
    %67 = arith.addf %66, %41 : vector<12x12xf32>
    %cst_30 = arith.constant dense<0xFF800000> : vector<12xf32>
    %68 = vector.multi_reduction <maximumf>, %67, %cst_30 [1] : vector<12x12xf32> to vector<12xf32>
    %69 = vector.shape_cast %68 : vector<12xf32> to vector<12x1xf32>
    %70 = vector.broadcast %69 : vector<12x1xf32> to vector<12x12xf32>
    %71 = arith.subf %67, %70 : vector<12x12xf32>
    %72 = math.exp %71 : vector<12x12xf32>
    %cst_31 = arith.constant dense<0.000000e+00> : vector<12xf32>
    %73 = vector.multi_reduction <add>, %72, %cst_31 [1] : vector<12x12xf32> to vector<12xf32>
    %74 = vector.shape_cast %73 : vector<12xf32> to vector<12x1xf32>
    %75 = tpu.reciprocal %74 {approx = true} : vector<12x1xf32> -> vector<12x1xf32>
    %76 = vector.broadcast %75 : vector<12x1xf32> to vector<12x12xf32>
    %77 = arith.mulf %72, %76 : vector<12x12xf32>
    %cst_32 = arith.constant dense<0.000000e+00> : vector<12x32xf32>
    %78 = tpu.matmul %77, %63, %cst_32 {dimension_numbers = #tpu.dot_dimension_numbers<[1], [0], [0], [1], [0, 0, 1, 1], [], []>} : vector<12x12xf32>, vector<12x32xf32>, vector<12x32xf32> -> vector<12x32xf32>
    %c0_33 = arith.constant 0 : index
    %c32 = arith.constant 32 : index
    %79 = vector.load %arg29[%c0_33, %c32] : memref<12x128xf32, #tpu.memory_space<vmem>>, vector<12x32xf32>
    tpu.vector_store %arg29[%c0_33, %c32], %78 {strides = array<i32>} : memref<12x128xf32, #tpu.memory_space<vmem>>, vector<12x32xf32>,
    %80 = vector.extract_strided_slice %38 {offsets = [0, 64], sizes = [12, 32], strides = [1, 1]} : vector<12x128xf32> to vector<12x32xf32>
    %81 = vector.extract_strided_slice %39 {offsets = [0, 64], sizes = [12, 32], strides = [1, 1]} : vector<12x128xf32> to vector<12x32xf32>
    %82 = vector.extract_strided_slice %40 {offsets = [0, 64], sizes = [12, 32], strides = [1, 1]} : vector<12x128xf32> to vector<12x32xf32>
    %cst_34 = arith.constant dense<0.000000e+00> : vector<12x12xf32>
    %83 = tpu.matmul %80, %81, %cst_34 {dimension_numbers = #tpu.dot_dimension_numbers<[1], [1], [0], [0], [0, 0, 1, 0], [], []>} : vector<12x32xf32>, vector<12x32xf32>, vector<12x12xf32> -> vector<12x12xf32>
    %cst_35 = arith.constant 0.176776692 : f32
    %84 = vector.broadcast %cst_35 : f32 to vector<12x12xf32>
    %85 = arith.mulf %83, %84 : vector<12x12xf32>
    %86 = arith.addf %85, %41 : vector<12x12xf32>
    %cst_36 = arith.constant dense<0xFF800000> : vector<12xf32>
    %87 = vector.multi_reduction <maximumf>, %86, %cst_36 [1] : vector<12x12xf32> to vector<12xf32>
    %88 = vector.shape_cast %87 : vector<12xf32> to vector<12x1xf32>
    %89 = vector.broadcast %88 : vector<12x1xf32> to vector<12x12xf32>
    %90 = arith.subf %86, %89 : vector<12x12xf32>
    %91 = math.exp %90 : vector<12x12xf32>
    %cst_37 = arith.constant dense<0.000000e+00> : vector<12xf32>
    %92 = vector.multi_reduction <add>, %91, %cst_37 [1] : vector<12x12xf32> to vector<12xf32>
    %93 = vector.shape_cast %92 : vector<12xf32> to vector<12x1xf32>
    %94 = tpu.reciprocal %93 {approx = true} : vector<12x1xf32> -> vector<12x1xf32>
    %95 = vector.broadcast %94 : vector<12x1xf32> to vector<12x12xf32>
    %96 = arith.mulf %91, %95 : vector<12x12xf32>
    %cst_38 = arith.constant dense<0.000000e+00> : vector<12x32xf32>
    %97 = tpu.matmul %96, %82, %cst_38 {dimension_numbers = #tpu.dot_dimension_numbers<[1], [0], [0], [1], [0, 0, 1, 1], [], []>} : vector<12x12xf32>, vector<12x32xf32>, vector<12x32xf32> -> vector<12x32xf32>
    %c0_39 = arith.constant 0 : index
    %c64 = arith.constant 64 : index
    %98 = vector.load %arg29[%c0_39, %c64] : memref<12x128xf32, #tpu.memory_space<vmem>>, vector<12x32xf32>
    tpu.vector_store %arg29[%c0_39, %c64], %97 {strides = array<i32>} : memref<12x128xf32, #tpu.memory_space<vmem>>, vector<12x32xf32>,
    %99 = vector.extract_strided_slice %38 {offsets = [0, 96], sizes = [12, 32], strides = [1, 1]} : vector<12x128xf32> to vector<12x32xf32>
    %100 = vector.extract_strided_slice %39 {offsets = [0, 96], sizes = [12, 32], strides = [1, 1]} : vector<12x128xf32> to vector<12x32xf32>
    %101 = vector.extract_strided_slice %40 {offsets = [0, 96], sizes = [12, 32], strides = [1, 1]} : vector<12x128xf32> to vector<12x32xf32>
    %cst_40 = arith.constant dense<0.000000e+00> : vector<12x12xf32>
    %102 = tpu.matmul %99, %100, %cst_40 {dimension_numbers = #tpu.dot_dimension_numbers<[1], [1], [0], [0], [0, 0, 1, 0], [], []>} : vector<12x32xf32>, vector<12x32xf32>, vector<12x12xf32> -> vector<12x12xf32>
    %cst_41 = arith.constant 0.176776692 : f32
    %103 = vector.broadcast %cst_41 : f32 to vector<12x12xf32>
    %104 = arith.mulf %102, %103 : vector<12x12xf32>
    %105 = arith.addf %104, %41 : vector<12x12xf32>
    %cst_42 = arith.constant dense<0xFF800000> : vector<12xf32>
    %106 = vector.multi_reduction <maximumf>, %105, %cst_42 [1] : vector<12x12xf32> to vector<12xf32>
    %107 = vector.shape_cast %106 : vector<12xf32> to vector<12x1xf32>
    %108 = vector.broadcast %107 : vector<12x1xf32> to vector<12x12xf32>
    %109 = arith.subf %105, %108 : vector<12x12xf32>
    %110 = math.exp %109 : vector<12x12xf32>
    %cst_43 = arith.constant dense<0.000000e+00> : vector<12xf32>
    %111 = vector.multi_reduction <add>, %110, %cst_43 [1] : vector<12x12xf32> to vector<12xf32>
    %112 = vector.shape_cast %111 : vector<12xf32> to vector<12x1xf32>
    %113 = tpu.reciprocal %112 {approx = true} : vector<12x1xf32> -> vector<12x1xf32>
    %114 = vector.broadcast %113 : vector<12x1xf32> to vector<12x12xf32>
    %115 = arith.mulf %110, %114 : vector<12x12xf32>
    %cst_44 = arith.constant dense<0.000000e+00> : vector<12x32xf32>
    %116 = tpu.matmul %115, %101, %cst_44 {dimension_numbers = #tpu.dot_dimension_numbers<[1], [0], [0], [1], [0, 0, 1, 1], [], []>} : vector<12x12xf32>, vector<12x32xf32>, vector<12x32xf32> -> vector<12x32xf32>
    %c0_45 = arith.constant 0 : index
    %c96 = arith.constant 96 : index
    %117 = vector.load %arg29[%c0_45, %c96] : memref<12x128xf32, #tpu.memory_space<vmem>>, vector<12x32xf32>
    tpu.vector_store %arg29[%c0_45, %c96], %116 {strides = array<i32>} : memref<12x128xf32, #tpu.memory_space<vmem>>, vector<12x32xf32>,
    %c0_46 = arith.constant 0 : index
    %c0_47 = arith.constant 0 : index
    %118 = vector.load %arg29[%c0_46, %c0_47] : memref<12x128xf32, #tpu.memory_space<vmem>>, vector<12x128xf32>
    %119 = arith.truncf %118 : vector<12x128xf32> to vector<12x128xbf16>
    %c0_48 = arith.constant 0 : index
    %c0_49 = arith.constant 0 : index
    %c0_50 = arith.constant 0 : index
    %120 = vector.load %arg17[%c0_48, %c0_49, %c0_50] : memref<1x128x128xbf16, #tpu.memory_space<vmem>>, vector<1x128x128xbf16>
    %121 = vector.shape_cast %120 : vector<1x128x128xbf16> to vector<128x128xbf16>
    %cst_51 = arith.constant dense<0.000000e+00> : vector<12x128xf32>
    %122 = tpu.matmul %119, %121, %cst_51 {dimension_numbers = #tpu.dot_dimension_numbers<[1], [0], [0], [1], [0, 0, 1, 1], [], []>} : vector<12x128xbf16>, vector<128x128xbf16>, vector<12x128xf32> -> vector<12x128xf32>
    %c0_52 = arith.constant 0 : index
    %c0_53 = arith.constant 0 : index
    %c0_54 = arith.constant 0 : index
    %123 = vector.load %arg18[%c0_52, %c0_53, %c0_54] : memref<1x1x128xf32, #tpu.memory_space<vmem>>, vector<1x1x128xf32>
    %124 = vector.shape_cast %123 : vector<1x1x128xf32> to vector<1x128xf32>
    %125 = vector.broadcast %124 : vector<1x128xf32> to vector<12x128xf32>
    %126 = arith.addf %122, %125 : vector<12x128xf32>
    %127 = arith.addf %3, %126 : vector<12x128xf32>
    %c0_55 = arith.constant 0 : index
    %c0_56 = arith.constant 0 : index
    %c0_57 = arith.constant 0 : index
    %128 = vector.load %arg19[%c0_55, %c0_56, %c0_57] : memref<1x1x128xf32, #tpu.memory_space<vmem>>, vector<1x1x128xf32>
    %129 = vector.shape_cast %128 : vector<1x1x128xf32> to vector<1x128xf32>
    %c0_58 = arith.constant 0 : index
    %c0_59 = arith.constant 0 : index
    %c0_60 = arith.constant 0 : index
    %130 = vector.load %arg20[%c0_58, %c0_59, %c0_60] : memref<1x1x128xf32, #tpu.memory_space<vmem>>, vector<1x1x128xf32>
    %131 = vector.shape_cast %130 : vector<1x1x128xf32> to vector<1x128xf32>
    %cst_61 = arith.constant dense<0.000000e+00> : vector<12xf32>
    %132 = vector.multi_reduction <add>, %127, %cst_61 [1] : vector<12x128xf32> to vector<12xf32>
    %133 = vector.shape_cast %132 : vector<12xf32> to vector<12x1xf32>
    %cst_62 = arith.constant 1.280000e+02 : f32
    %134 = vector.broadcast %cst_62 : f32 to vector<12x1xf32>
    %135 = arith.divf %133, %134 : vector<12x1xf32>
    %136 = vector.broadcast %135 : vector<12x1xf32> to vector<12x128xf32>
    %137 = arith.subf %127, %136 : vector<12x128xf32>
    %138 = arith.mulf %137, %137 : vector<12x128xf32>
    %cst_63 = arith.constant dense<0.000000e+00> : vector<12xf32>
    %139 = vector.multi_reduction <add>, %138, %cst_63 [1] : vector<12x128xf32> to vector<12xf32>
    %140 = vector.shape_cast %139 : vector<12xf32> to vector<12x1xf32>
    %cst_64 = arith.constant 1.280000e+02 : f32
    %141 = vector.broadcast %cst_64 : f32 to vector<12x1xf32>
    %142 = arith.divf %140, %141 : vector<12x1xf32>
    %143 = vector.broadcast %135 : vector<12x1xf32> to vector<12x128xf32>
    %144 = arith.subf %127, %143 : vector<12x128xf32>
    %cst_65 = arith.constant 9.99999997E-7 : f32
    %145 = vector.broadcast %cst_65 : f32 to vector<12x1xf32>
    %146 = arith.addf %142, %145 : vector<12x1xf32>
    %147 = math.rsqrt %146 : vector<12x1xf32>
    %148 = vector.broadcast %147 : vector<12x1xf32> to vector<12x128xf32>
    %149 = arith.mulf %144, %148 : vector<12x128xf32>
    %150 = vector.broadcast %129 : vector<1x128xf32> to vector<12x128xf32>
    %151 = arith.mulf %149, %150 : vector<12x128xf32>
    %152 = vector.broadcast %131 : vector<1x128xf32> to vector<12x128xf32>
    %153 = arith.addf %151, %152 : vector<12x128xf32>
    %154 = arith.truncf %153 : vector<12x128xf32> to vector<12x128xbf16>
    %c0_66 = arith.constant 0 : index
    %c0_67 = arith.constant 0 : index
    %c0_68 = arith.constant 0 : index
    %155 = vector.load %arg21[%c0_66, %c0_67, %c0_68] : memref<1x128x512xbf16, #tpu.memory_space<vmem>>, vector<1x128x512xbf16>
    %156 = vector.shape_cast %155 : vector<1x128x512xbf16> to vector<128x512xbf16>
    %cst_69 = arith.constant dense<0.000000e+00> : vector<12x512xf32>
    %157 = tpu.matmul %154, %156, %cst_69 {dimension_numbers = #tpu.dot_dimension_numbers<[1], [0], [0], [1], [0, 0, 1, 1], [], []>} : vector<12x128xbf16>, vector<128x512xbf16>, vector<12x512xf32> -> vector<12x512xf32>
    %c0_70 = arith.constant 0 : index
    %c0_71 = arith.constant 0 : index
    %c0_72 = arith.constant 0 : index
    %158 = vector.load %arg22[%c0_70, %c0_71, %c0_72] : memref<1x1x512xf32, #tpu.memory_space<vmem>>, vector<1x1x512xf32>
    %159 = vector.shape_cast %158 : vector<1x1x512xf32> to vector<1x512xf32>
    %160 = vector.broadcast %159 : vector<1x512xf32> to vector<12x512xf32>
    %161 = arith.addf %157, %160 : vector<12x512xf32>
    %cst_73 = arith.constant 5.000000e-01 : f32
    %162 = vector.broadcast %cst_73 : f32 to vector<12x512xf32>
    %163 = arith.mulf %162, %161 : vector<12x512xf32>
    %cst_74 = arith.constant 4.471500e-02 : f32
    %164 = vector.broadcast %cst_74 : f32 to vector<12x512xf32>
    %165 = arith.mulf %164, %161 : vector<12x512xf32>
    %166 = arith.mulf %165, %161 : vector<12x512xf32>
    %167 = arith.mulf %166, %161 : vector<12x512xf32>
    %168 = arith.addf %161, %167 : vector<12x512xf32>
    %cst_75 = arith.constant 0.797884583 : f32
    %169 = vector.broadcast %cst_75 : f32 to vector<12x512xf32>
    %170 = arith.mulf %169, %168 : vector<12x512xf32>
    %171 = math.tanh %170 : vector<12x512xf32>
    %cst_76 = arith.constant 1.000000e+00 : f32
    %172 = vector.broadcast %cst_76 : f32 to vector<12x512xf32>
    %173 = arith.addf %172, %171 : vector<12x512xf32>
    %174 = arith.mulf %163, %173 : vector<12x512xf32>
    %175 = arith.truncf %174 : vector<12x512xf32> to vector<12x512xbf16>
    %c0_77 = arith.constant 0 : index
    %c0_78 = arith.constant 0 : index
    %c0_79 = arith.constant 0 : index
    %176 = vector.load %arg23[%c0_77, %c0_78, %c0_79] : memref<1x512x128xbf16, #tpu.memory_space<vmem>>, vector<1x512x128xbf16>
    %177 = vector.shape_cast %176 : vector<1x512x128xbf16> to vector<512x128xbf16>
    %cst_80 = arith.constant dense<0.000000e+00> : vector<12x128xf32>
    %178 = tpu.matmul %175, %177, %cst_80 {dimension_numbers = #tpu.dot_dimension_numbers<[1], [0], [0], [1], [0, 0, 1, 1], [], []>} : vector<12x512xbf16>, vector<512x128xbf16>, vector<12x128xf32> -> vector<12x128xf32>
    %c0_81 = arith.constant 0 : index
    %c0_82 = arith.constant 0 : index
    %c0_83 = arith.constant 0 : index
    %179 = vector.load %arg24[%c0_81, %c0_82, %c0_83] : memref<1x1x128xf32, #tpu.memory_space<vmem>>, vector<1x1x128xf32>
    %180 = vector.shape_cast %179 : vector<1x1x128xf32> to vector<1x128xf32>
    %181 = vector.broadcast %180 : vector<1x128xf32> to vector<12x128xf32>
    %182 = arith.addf %178, %181 : vector<12x128xf32>
    %183 = arith.addf %127, %182 : vector<12x128xf32>
    %c0_84 = arith.constant 0 : index
    %c0_85 = arith.constant 0 : index
    %184 = vector.load %arg28[%c0_84, %c0_85] : memref<12x128xf32, #tpu.memory_space<vmem>>, vector<12x128xf32>
    tpu.vector_store %arg28[%c0_84, %c0_85], %183 {strides = array<i32>} : memref<12x128xf32, #tpu.memory_space<vmem>>, vector<12x128xf32>,
    %c1_i32 = arith.constant 1 : i32
    %185 = arith.cmpi eq, %arg0, %c1_i32 : i32
    %186 = arith.extui %185 : i1 to i32
    %c0_i32_86 = arith.constant 0 : i32
    %187 = arith.cmpi ne, %186, %c0_i32_86 : i32
    scf.if %187 {
      %c0_87 = arith.constant 0 : index
      %c0_88 = arith.constant 0 : index
      %188 = tpu.strided_load %arg28[%c0_87, %c0_88] {strides = array<i32: 6, 1>} : memref<12x128xf32, #tpu.memory_space<vmem>>, vector<2x128xf32>
      %c1 = arith.constant 1 : index
      %c0_89 = arith.constant 0 : index
      %189 = tpu.strided_load %arg28[%c1, %c0_89] {strides = array<i32: 6, 1>} : memref<12x128xf32, #tpu.memory_space<vmem>>, vector<2x128xf32>
      %c0_90 = arith.constant 0 : index
      %c0_91 = arith.constant 0 : index
      %190 = vector.load %arg7[%c0_90, %c0_91] : memref<1x128xf32, #tpu.memory_space<vmem>>, vector<1x128xf32>
      %c0_92 = arith.constant 0 : index
      %c0_93 = arith.constant 0 : index
      %191 = vector.load %arg8[%c0_92, %c0_93] : memref<1x128xf32, #tpu.memory_space<vmem>>, vector<1x128xf32>
      %cst_94 = arith.constant dense<0.000000e+00> : vector<2xf32>
      %192 = vector.multi_reduction <add>, %188, %cst_94 [1] : vector<2x128xf32> to vector<2xf32>
      %193 = vector.shape_cast %192 : vector<2xf32> to vector<2x1xf32>
      %cst_95 = arith.constant 1.280000e+02 : f32
      %194 = vector.broadcast %cst_95 : f32 to vector<2x1xf32>
      %195 = arith.divf %193, %194 : vector<2x1xf32>
      %196 = vector.broadcast %195 : vector<2x1xf32> to vector<2x128xf32>
      %197 = arith.subf %188, %196 : vector<2x128xf32>
      %198 = arith.mulf %197, %197 : vector<2x128xf32>
      %cst_96 = arith.constant dense<0.000000e+00> : vector<2xf32>
      %199 = vector.multi_reduction <add>, %198, %cst_96 [1] : vector<2x128xf32> to vector<2xf32>
      %200 = vector.shape_cast %199 : vector<2xf32> to vector<2x1xf32>
      %cst_97 = arith.constant 1.280000e+02 : f32
      %201 = vector.broadcast %cst_97 : f32 to vector<2x1xf32>
      %202 = arith.divf %200, %201 : vector<2x1xf32>
      %203 = vector.broadcast %195 : vector<2x1xf32> to vector<2x128xf32>
      %204 = arith.subf %188, %203 : vector<2x128xf32>
      %cst_98 = arith.constant 9.99999997E-7 : f32
      %205 = vector.broadcast %cst_98 : f32 to vector<2x1xf32>
      %206 = arith.addf %202, %205 : vector<2x1xf32>
      %207 = math.rsqrt %206 : vector<2x1xf32>
      %208 = vector.broadcast %207 : vector<2x1xf32> to vector<2x128xf32>
      %209 = arith.mulf %204, %208 : vector<2x128xf32>
      %210 = vector.broadcast %190 : vector<1x128xf32> to vector<2x128xf32>
      %211 = arith.mulf %209, %210 : vector<2x128xf32>
      %212 = vector.broadcast %191 : vector<1x128xf32> to vector<2x128xf32>
      %213 = arith.addf %211, %212 : vector<2x128xf32>
      %cst_99 = arith.constant 0.999994993 : f32
      %214 = vector.broadcast %cst_99 : f32 to vector<2x128xf32>
      %215 = arith.mulf %213, %214 : vector<2x128xf32>
      %c0_100 = arith.constant 0 : index
      %c0_101 = arith.constant 0 : index
      %216 = vector.load %arg9[%c0_100, %c0_101] : memref<1x128xf32, #tpu.memory_space<vmem>>, vector<1x128xf32>
      %217 = vector.broadcast %216 : vector<1x128xf32> to vector<2x128xf32>
      %218 = arith.mulf %215, %217 : vector<2x128xf32>
      %c0_102 = arith.constant 0 : index
      %c0_103 = arith.constant 0 : index
      %219 = vector.load %arg10[%c0_102, %c0_103] : memref<1x128xf32, #tpu.memory_space<vmem>>, vector<1x128xf32>
      %220 = vector.broadcast %219 : vector<1x128xf32> to vector<2x128xf32>
      %221 = arith.addf %218, %220 : vector<2x128xf32>
      %c0_104 = arith.constant 0 : index
      %c0_105 = arith.constant 0 : index
      %222 = vector.load %arg7[%c0_104, %c0_105] : memref<1x128xf32, #tpu.memory_space<vmem>>, vector<1x128xf32>
      %c0_106 = arith.constant 0 : index
      %c0_107 = arith.constant 0 : index
      %223 = vector.load %arg8[%c0_106, %c0_107] : memref<1x128xf32, #tpu.memory_space<vmem>>, vector<1x128xf32>
      %cst_108 = arith.constant dense<0.000000e+00> : vector<2xf32>
      %224 = vector.multi_reduction <add>, %189, %cst_108 [1] : vector<2x128xf32> to vector<2xf32>
      %225 = vector.shape_cast %224 : vector<2xf32> to vector<2x1xf32>
      %cst_109 = arith.constant 1.280000e+02 : f32
      %226 = vector.broadcast %cst_109 : f32 to vector<2x1xf32>
      %227 = arith.divf %225, %226 : vector<2x1xf32>
      %228 = vector.broadcast %227 : vector<2x1xf32> to vector<2x128xf32>
      %229 = arith.subf %189, %228 : vector<2x128xf32>
      %230 = arith.mulf %229, %229 : vector<2x128xf32>
      %cst_110 = arith.constant dense<0.000000e+00> : vector<2xf32>
      %231 = vector.multi_reduction <add>, %230, %cst_110 [1] : vector<2x128xf32> to vector<2xf32>
      %232 = vector.shape_cast %231 : vector<2xf32> to vector<2x1xf32>
      %cst_111 = arith.constant 1.280000e+02 : f32
      %233 = vector.broadcast %cst_111 : f32 to vector<2x1xf32>
      %234 = arith.divf %232, %233 : vector<2x1xf32>
      %235 = vector.broadcast %227 : vector<2x1xf32> to vector<2x128xf32>
      %236 = arith.subf %189, %235 : vector<2x128xf32>
      %cst_112 = arith.constant 9.99999997E-7 : f32
      %237 = vector.broadcast %cst_112 : f32 to vector<2x1xf32>
      %238 = arith.addf %234, %237 : vector<2x1xf32>
      %239 = math.rsqrt %238 : vector<2x1xf32>
      %240 = vector.broadcast %239 : vector<2x1xf32> to vector<2x128xf32>
      %241 = arith.mulf %236, %240 : vector<2x128xf32>
      %242 = vector.broadcast %222 : vector<1x128xf32> to vector<2x128xf32>
      %243 = arith.mulf %241, %242 : vector<2x128xf32>
      %244 = vector.broadcast %223 : vector<1x128xf32> to vector<2x128xf32>
      %245 = arith.addf %243, %244 : vector<2x128xf32>
      %cst_113 = arith.constant 0.999994993 : f32
      %246 = vector.broadcast %cst_113 : f32 to vector<2x128xf32>
      %247 = arith.mulf %245, %246 : vector<2x128xf32>
      %c0_114 = arith.constant 0 : index
      %c0_115 = arith.constant 0 : index
      %248 = vector.load %arg11[%c0_114, %c0_115] : memref<1x128xf32, #tpu.memory_space<vmem>>, vector<1x128xf32>
      %249 = vector.broadcast %248 : vector<1x128xf32> to vector<2x128xf32>
      %250 = arith.mulf %247, %249 : vector<2x128xf32>
      %c0_116 = arith.constant 0 : index
      %c0_117 = arith.constant 0 : index
      %251 = vector.load %arg12[%c0_116, %c0_117] : memref<1x128xf32, #tpu.memory_space<vmem>>, vector<1x128xf32>
      %252 = vector.broadcast %251 : vector<1x128xf32> to vector<2x128xf32>
      %253 = arith.addf %250, %252 : vector<2x128xf32>
      %c0_118 = arith.constant 0 : index
      %c0_119 = arith.constant 0 : index
      %254 = vector.load %arg26[%c0_118, %c0_119] : memref<2x128xf32, #tpu.memory_space<vmem>>, vector<2x128xf32>
      tpu.vector_store %arg26[%c0_118, %c0_119], %221 {strides = array<i32>} : memref<2x128xf32, #tpu.memory_space<vmem>>, vector<2x128xf32>,
      %c0_120 = arith.constant 0 : index
      %c0_121 = arith.constant 0 : index
      %255 = vector.load %arg27[%c0_120, %c0_121] : memref<2x128xf32, #tpu.memory_space<vmem>>, vector<2x128xf32>
      tpu.vector_store %arg27[%c0_120, %c0_121], %253 {strides = array<i32>} : memref<2x128xf32, #tpu.memory_space<vmem>>, vector<2x128xf32>,
      %c0_122 = arith.constant 0 : index
      %c0_123 = arith.constant 0 : index
      %256 = vector.load %arg25[%c0_122, %c0_123] : memref<2x256xf32, #tpu.memory_space<vmem>>, vector<2x128xf32>
      tpu.vector_store %arg25[%c0_122, %c0_123], %221 {strides = array<i32>} : memref<2x256xf32, #tpu.memory_space<vmem>>, vector<2x128xf32>,
      %c0_124 = arith.constant 0 : index
      %c128 = arith.constant 128 : index
      %257 = vector.load %arg25[%c0_124, %c128] : memref<2x256xf32, #tpu.memory_space<vmem>>, vector<2x128xf32>
      tpu.vector_store %arg25[%c0_124, %c128], %253 {strides = array<i32>} : memref<2x256xf32, #tpu.memory_space<vmem>>, vector<2x128xf32>,
    } else {
    }
    return
  }
  func.func @transform_0(%arg0: i32) -> (i32, i32) {
    %c0_i32 = arith.constant 0 : i32
    %c0_i32_0 = arith.constant 0 : i32
    %c0_i32_1 = arith.constant 0 : i32
    return %c0_i32, %c0_i32_0 : i32, i32
  }
  func.func @transform_1(%arg0: i32) -> (i32, i32) {
    %c0_i32 = arith.constant 0 : i32
    %c0_i32_0 = arith.constant 0 : i32
    %c0_i32_1 = arith.constant 0 : i32
    return %c0_i32, %c0_i32_0 : i32, i32
  }
  func.func @transform_2(%arg0: i32) -> (i32, i32) {
    %c0_i32 = arith.constant 0 : i32
    %c0_i32_0 = arith.constant 0 : i32
    %c0_i32_1 = arith.constant 0 : i32
    return %c0_i32, %c0_i32_0 : i32, i32
  }
  func.func @transform_3(%arg0: i32) -> (i32, i32) {
    %c0_i32 = arith.constant 0 : i32
    %c0_i32_0 = arith.constant 0 : i32
    %c0_i32_1 = arith.constant 0 : i32
    return %c0_i32, %c0_i32_0 : i32, i32
  }
  func.func @transform_4(%arg0: i32) -> (i32, i32) {
    %c0_i32 = arith.constant 0 : i32
    %c0_i32_0 = arith.constant 0 : i32
    %c0_i32_1 = arith.constant 0 : i32
    return %c0_i32, %c0_i32_0 : i32, i32
  }
  func.func @transform_5(%arg0: i32) -> (i32, i32) {
    %c0_i32 = arith.constant 0 : i32
    %c0_i32_0 = arith.constant 0 : i32
    %c0_i32_1 = arith.constant 0 : i32
    return %c0_i32, %c0_i32_0 : i32, i32
  }
  func.func @transform_6(%arg0: i32) -> (i32, i32) {
    %c0_i32 = arith.constant 0 : i32
    %c0_i32_0 = arith.constant 0 : i32
    %c0_i32_1 = arith.constant 0 : i32
    return %c0_i32, %c0_i32_0 : i32, i32
  }
  func.func @transform_7(%arg0: i32) -> (i32, i32) {
    %c0_i32 = arith.constant 0 : i32
    %c0_i32_0 = arith.constant 0 : i32
    %c0_i32_1 = arith.constant 0 : i32
    return %c0_i32, %c0_i32_0 : i32, i32
  }
  func.func @transform_8(%arg0: i32) -> (i32, i32) {
    %c0_i32 = arith.constant 0 : i32
    %c0_i32_0 = arith.constant 0 : i32
    %c0_i32_1 = arith.constant 0 : i32
    return %c0_i32, %c0_i32_0 : i32, i32
  }
  func.func @transform_9(%arg0: i32) -> (i32, i32) {
    %c0_i32 = arith.constant 0 : i32
    %c0_i32_0 = arith.constant 0 : i32
    %c0_i32_1 = arith.constant 0 : i32
    return %c0_i32, %c0_i32_0 : i32, i32
  }
  func.func @transform_10(%arg0: i32) -> (i32, i32) {
    %c0_i32 = arith.constant 0 : i32
    %c0_i32_0 = arith.constant 0 : i32
    %c0_i32_1 = arith.constant 0 : i32
    return %c0_i32, %c0_i32_0 : i32, i32
  }
  func.func @transform_11(%arg0: i32) -> (i32, i32) {
    %c0_i32 = arith.constant 0 : i32
    %c0_i32_0 = arith.constant 0 : i32
    %c0_i32_1 = arith.constant 0 : i32
    return %c0_i32, %c0_i32_0 : i32, i32
  }
  func.func @transform_12(%arg0: i32) -> (i32, i32, i32) {
    %c0_i32 = arith.constant 0 : i32
    %c0_i32_0 = arith.constant 0 : i32
    %c0_i32_1 = arith.constant 0 : i32
    return %arg0, %c0_i32, %c0_i32_0 : i32, i32, i32
  }
  func.func @transform_13(%arg0: i32) -> (i32, i32, i32) {
    %c0_i32 = arith.constant 0 : i32
    %c0_i32_0 = arith.constant 0 : i32
    %c0_i32_1 = arith.constant 0 : i32
    return %arg0, %c0_i32, %c0_i32_0 : i32, i32, i32
  }
  func.func @transform_14(%arg0: i32) -> (i32, i32, i32) {
    %c0_i32 = arith.constant 0 : i32
    %c0_i32_0 = arith.constant 0 : i32
    %c0_i32_1 = arith.constant 0 : i32
    return %arg0, %c0_i32, %c0_i32_0 : i32, i32, i32
  }
  func.func @transform_15(%arg0: i32) -> (i32, i32, i32) {
    %c0_i32 = arith.constant 0 : i32
    %c0_i32_0 = arith.constant 0 : i32
    %c0_i32_1 = arith.constant 0 : i32
    return %arg0, %c0_i32, %c0_i32_0 : i32, i32, i32
  }
  func.func @transform_16(%arg0: i32) -> (i32, i32, i32) {
    %c0_i32 = arith.constant 0 : i32
    %c0_i32_0 = arith.constant 0 : i32
    %c0_i32_1 = arith.constant 0 : i32
    return %arg0, %c0_i32, %c0_i32_0 : i32, i32, i32
  }
  func.func @transform_17(%arg0: i32) -> (i32, i32, i32) {
    %c0_i32 = arith.constant 0 : i32
    %c0_i32_0 = arith.constant 0 : i32
    %c0_i32_1 = arith.constant 0 : i32
    return %arg0, %c0_i32, %c0_i32_0 : i32, i32, i32
  }
  func.func @transform_18(%arg0: i32) -> (i32, i32, i32) {
    %c0_i32 = arith.constant 0 : i32
    %c0_i32_0 = arith.constant 0 : i32
    %c0_i32_1 = arith.constant 0 : i32
    return %arg0, %c0_i32, %c0_i32_0 : i32, i32, i32
  }
  func.func @transform_19(%arg0: i32) -> (i32, i32, i32) {
    %c0_i32 = arith.constant 0 : i32
    %c0_i32_0 = arith.constant 0 : i32
    %c0_i32_1 = arith.constant 0 : i32
    return %arg0, %c0_i32, %c0_i32_0 : i32, i32, i32
  }
  func.func @transform_20(%arg0: i32) -> (i32, i32, i32) {
    %c0_i32 = arith.constant 0 : i32
    %c0_i32_0 = arith.constant 0 : i32
    %c0_i32_1 = arith.constant 0 : i32
    return %arg0, %c0_i32, %c0_i32_0 : i32, i32, i32
  }
  func.func @transform_21(%arg0: i32) -> (i32, i32, i32) {
    %c0_i32 = arith.constant 0 : i32
    %c0_i32_0 = arith.constant 0 : i32
    %c0_i32_1 = arith.constant 0 : i32
    return %arg0, %c0_i32, %c0_i32_0 : i32, i32, i32
  }
  func.func @transform_22(%arg0: i32) -> (i32, i32, i32) {
    %c0_i32 = arith.constant 0 : i32
    %c0_i32_0 = arith.constant 0 : i32
    %c0_i32_1 = arith.constant 0 : i32
    return %arg0, %c0_i32, %c0_i32_0 : i32, i32, i32
  }
  func.func @transform_23(%arg0: i32) -> (i32, i32, i32) {
    %c0_i32 = arith.constant 0 : i32
    %c0_i32_0 = arith.constant 0 : i32
    %c0_i32_1 = arith.constant 0 : i32
    return %arg0, %c0_i32, %c0_i32_0 : i32, i32, i32
  }
  func.func @transform_24(%arg0: i32) -> (i32, i32) {
    %c0_i32 = arith.constant 0 : i32
    %c0_i32_0 = arith.constant 0 : i32
    %c0_i32_1 = arith.constant 0 : i32
    return %c0_i32, %c0_i32_0 : i32, i32
  }
  func.func @transform_25(%arg0: i32) -> (i32, i32) {
    %c0_i32 = arith.constant 0 : i32
    %c0_i32_0 = arith.constant 0 : i32
    %c0_i32_1 = arith.constant 0 : i32
    return %c0_i32, %c0_i32_0 : i32, i32
  }
  func.func @transform_26(%arg0: i32) -> (i32, i32) {
    %c0_i32 = arith.constant 0 : i32
    %c0_i32_0 = arith.constant 0 : i32
    %c0_i32_1 = arith.constant 0 : i32
    return %c0_i32, %c0_i32_0 : i32, i32
  }
}

</mosaic_0001>

<bundles_post_ra>
// kernel: vitca_forward.1
= control target key start
LH: loop header
LB: loop body
LE: loop exit
PB: predicated region body
PF: predicated region fallthrough
CT: control target
= control target key end

     0   :  { %s6249_s0 = inlined_call_operand.vmem [shape: bf16[8,768], index: 0, kind: input, shape index: {}]   ;;  %s6250_s1 = inlined_call_operand.hbm [shape: bf16[768,128], index: 1, kind: input, shape index: {}]   ;;  %s6251_s2 = inlined_call_operand.vmem [shape: f32[1,128], index: 2, kind: input, shape index: {}]   ;;  %s6252_s3 = inlined_call_operand.hbm [shape: f32[2,128], index: 3, kind: input, shape index: {}]   ;;  %s6253_s4 = inlined_call_operand.vmem [shape: f32[6,128], index: 4, kind: input, shape index: {}]   ;;  %s6254_s5 = inlined_call_operand.vmem [shape: f32[12,12], index: 5, kind: input, shape index: {}]   ;;  %s6255_s6 = inlined_call_operand.vmem [shape: f32[1,128], index: 6, kind: input, shape index: {}]   ;;  %s6256_s7 = inlined_call_operand.vmem [shape: f32[1,128], index: 7, kind: input, shape index: {}]   ;;  %s6257_s8 = inlined_call_operand.hbm [shape: f32[1,128], index: 8, kind: input, shape index: {}]   ;;  %s6258_s9 = inlined_call_operand.hbm [shape: f32[1,128], index: 9, kind: input, shape index: {}]   ;;  %s6259_s10 = inlined_call_operand.hbm [shape: f32[1,128], index: 10, kind: input, shape index: {}]   ;;  %s6260_s11 = inlined_call_operand.hbm [shape: f32[1,128], index: 11, kind: input, shape index: {}]   ;;  %s6261_s12 = inlined_call_operand.vmem [shape: f32[2,1,128], index: 12, kind: input, shape index: {}]   ;;  %s6262_s13 = inlined_call_operand.vmem [shape: f32[2,1,128], index: 13, kind: input, shape index: {}]   ;;  %s6263_s14 = inlined_call_operand.hbm [shape: bf16[2,128,384], index: 14, kind: input, shape index: {}]   ;;  %s6264_s15 = inlined_call_operand.vmem [shape: f32[2,1,384], index: 15, kind: input, shape index: {}]   ;;  %s6265_s16 = inlined_call_operand.vmem [shape: bf16[2,128,128], index: 16, kind: input, shape index: {}]   ;;  %s6266_s17 = inlined_call_operand.vmem [shape: f32[2,1,128], index: 17, kind: input, shape index: {}]   ;;  %s6267_s18 = inlined_call_operand.vmem [shape: f32[2,1,128], index: 18, kind: input, shape index: {}]   ;;  %s6268_s19 = inlined_call_operand.vmem [shape: f32[2,1,128], index: 19, kind: input, shape index: {}]   ;;  %s6269_s20 = inlined_call_operand.vmem [shape: bf16[2,128,512], index: 20, kind: input, shape index: {}]   ;;  %s6270_s21 = inlined_call_operand.vmem [shape: f32[2,1,512], index: 21, kind: input, shape index: {}]   ;;  %s6271_s22 = inlined_call_operand.vmem [shape: bf16[2,512,128], index: 22, kind: input, shape index: {}]   ;;  %s6272_s23 = inlined_call_operand.vmem [shape: f32[2,1,128], index: 23, kind: input, shape index: {}]   ;;  %s6273_s24 = inlined_call_operand.hbm [shape: f32[2,256], index: 24, kind: output, shape index: {0}]   ;;  %s6274_s25 = inlined_call_operand.hbm [shape: f32[2,128], index: 25, kind: output, shape index: {1}]   ;;  %s6275_s26 = inlined_call_operand.hbm [shape: f32[2,128], index: 26, kind: output, shape index: {2}]  }
   0x1   :  { %6293 = sst [smem:[#allocation28_spill]] %s6249_s0 }
   0x2   :  { %6294 = sst [smem:[#allocation29_spill]] %s6250_s1 }
   0x3   :  { %6295 = sst [smem:[#allocation30_spill]] %s6251_s2 }
   0x4   :  { %6296 = sst [smem:[#allocation31_spill]] %s6252_s3 }
   0x5   :  { %6297 = sst [smem:[#allocation32_spill]] %s6253_s4 }
   0x6   :  { %6298 = sst [smem:[#allocation33_spill]] %s6254_s5 }
   0x7   :  { %6299 = sst [smem:[#allocation34_spill]] %s6255_s6 }
   0x8   :  { %6300 = sst [smem:[#allocation35_spill]] %s6256_s7 }
   0x9   :  { %6301 = sst [smem:[#allocation36_spill]] %s6257_s8 }
   0xa   :  { %6302 = sst [smem:[#allocation37_spill]] %s6258_s9 }
   0xb   :  { %6303 = sst [smem:[#allocation38_spill]] %s6259_s10 }
   0xc   :  { %6304 = sst [smem:[#allocation39_spill]] %s6260_s11 }
   0xd   :  { %6305 = sst [smem:[#allocation40_spill]] %s6263_s14 }
   0xe   :  { %6306 = sst [smem:[#allocation41_spill]] %s6264_s15 }
   0xf   :  { %6307 = sst [smem:[#allocation42_spill]] %s6265_s16 }
  0x10   :  { %6308 = sst [smem:[#allocation43_spill]] %s6267_s18 }
  0x11   :  { %6309 = sst [smem:[#allocation44_spill]] %s6268_s19 }
  0x12   :  { %6310 = sst [smem:[#allocation45_spill]] %s6269_s20 }
  0x13   :  { %6311 = sst [smem:[#allocation46_spill]] %s6270_s21 }
  0x14   :  { %6312 = sst [smem:[#allocation47_spill]] %s6271_s22 }
  0x15   :  { %6313 = sst [smem:[#allocation48_spill]] %s6272_s23 }
  0x16   :  { %6314 = sst [smem:[#allocation49_spill]] %s6273_s24 }
  0x17   :  { %6315 = sst [smem:[#allocation50_spill]] %s6274_s25 }
  0x18   :  { %6316 = sst [smem:[#allocation51_spill]] %s6275_s26 }
  0x19   :  { %32 = vsyncpa [#allocation5], 0 }
  0x1a   :  { %33 = vsyncpa [#allocation8], 0 }
  0x1b   :  { %34 = vsyncpa [#allocation11], 0 }
  0x1c   :  { %35 = vsyncpa [#allocation14], 0 }
  0x1d   :  { %36 = vsyncpa [#allocation6], 0 }
  0x1e   :  { %37 = vsyncpa [#allocation18], 0  ;;  %s5438_s27 = smov 0   ;;  %s5440_s3 = smov 0  }
  0x1f   :  { %s5442_s7 = smov 0   ;;  %s5444_s28 = smov 0  }
  0x20 LB: > { %s5282_s8 = smov [#allocation4]   ;;  %s5459_s29 = sadd.s32 4294967295, %s5280_s28   ;;  %s5280_s28 = sphi %s5444_s28, %s6373_s28   ;;  %s5276_s7 = sphi %s5442_s7, %s6372_s7   ;;  %s5272_s3 = sphi %s5440_s3, %s6371_s3   ;;  %s5268_s27 = sphi %s5438_s27, %s6370_s27  }
  0x21   : > { %s690_s4 = sshll.u32 %s5282_s8, 4  ;;  %p4013_p0 = scmp.ge.s32.totalorder %s5280_s28, 1  ;;  %s5465_s4 = int_to_ptr.vmem [resolvable:$true] %s690_s4 }
  0x22   : > { %p6287_p1 = scmp.eq.s32.totalorder %s5459_s29, 0  ;;  %p675_p2 = scmp.lt.s32.totalorder %s5280_s28, 3 }
  0x23   : > { %s5283_s9 = smov [#allocation7]   ;;  %s5284_s5 = smov [#allocation10]  }
  0x24   : > { %p5467_p4 = pnand %p4013_p0, %p675_p2  ;;  %s707_s30 = sshll.u32 %s5283_s9, 4  ;;  %s5479_s30 = int_to_ptr.vmem [resolvable:$true] %s707_s30 }
  0x25   : > { %s741_s10 = sshll.u32 %s5284_s5, 4  ;;  %s6319_s8 = sld [smem:[#allocation29_spill]]  ;;  %s5481_s10 = int_to_ptr.vmem [resolvable:$true] %s741_s10 }
  0x26   : > { %s6317_s0 = scalar_select %p5467_p4, 1, 0 }
  0x27   : > { %p4586_p5 = pneg %p5467_p4 }
  0x29   : > { %p5475_p6 = pnand %p4586_p5, %p6287_p1 }
  0x2b   : > { %s4946_s26 = scalar_lea.hbm %s6319_s8, 6144  ;;  %p5491_p8 = pneg %p5475_p6 }
  0x2c   : > { %p4947_p7 = scmp.ne.s32.totalorder %s6319_s8, %s4946_s26  ;;  %p4953_p11 = scmp.lt.u32.totalorder %s4946_s26, %s6319_s8 }
  0x2e   : > { %p4949_p9 = pnand %p5491_p8, %p4947_p7 }
  0x30   : > { %p4950_p10 = pneg %p4949_p9 }
  0x32   : > { %p4955_p12 = pnand %p4953_p11, %p4950_p10 }
  0x34   : > { %4958 = shalt.err (!%p4955_p12)
}
  0x35   : > { %s4959_s24 = scalar_lea.vmem %s5465_s4, 6144  ;;  %p4967_p5 = scmp.lt.s32.totalorder %s5465_s4, %s5465_s4 }
  0x36   : > { %p4960_p13 = scmp.ne.s32.totalorder %s5465_s4, %s4959_s24  ;;  %p4968_p3 = scmp.lt.s32.totalorder %s4959_s24, %s4959_s24 }
  0x38   : > { %p4962_p0 = pnand %p4960_p13, %p5491_p8  ;;  %p4969_p7 = por %p4968_p3, %p4967_p5 }
  0x3a   : > { %p4963_p2 = pneg %p4962_p0 }
  0x3c   : > { %p4970_p9 = pnand %p4969_p7, %p4963_p2 }
  0x3e   : > { %4973 = shalt.err (!%p4970_p9)
}
  0x3f   : > { %s5285_s25 = smov 64   ;;  %s5286_s23 = smov 4  }
  0x40   : > { %4589 = dma.hbm_to_vmem [thread:$0]  (!%p5475_p6), %s6319_s8, 6144, %s5465_s4, [#allocation5], %s5285_s25, %s5285_s25, %s5286_s23  }
  0x41   : > { %s6321_s22 = sld [smem:[#allocation31_spill]] }
  0x47   : > { %s4974_s21 = scalar_lea.hbm %s6321_s22, 32 }
  0x48   : > { %p4975_p3 = scmp.ne.s32.totalorder %s6321_s22, %s4974_s21  ;;  %p4981_p12 = scmp.lt.u32.totalorder %s4974_s21, %s6321_s22 }
  0x4a   : > { %p4977_p10 = pnand %p4975_p3, %p5491_p8 }
  0x4c   : > { %p4978_p11 = pneg %p4977_p10 }
  0x4e   : > { %p4983_p13 = pnand %p4981_p12, %p4978_p11 }
  0x50   : > { %4986 = shalt.err (!%p4983_p13)
}
  0x51   : > { %s4987_s4 = scalar_lea.vmem %s5479_s30, 32  ;;  %p4995_p7 = scmp.lt.s32.totalorder %s5479_s30, %s5479_s30 }
  0x52   : > { %p4988_p0 = scmp.ne.s32.totalorder %s5479_s30, %s4987_s4  ;;  %p4996_p9 = scmp.lt.s32.totalorder %s4987_s4, %s4987_s4 }
  0x54   : > { %p4990_p2 = pnand %p4988_p0, %p5491_p8  ;;  %p4997_p3 = por %p4996_p9, %p4995_p7 }
  0x56   : > { %p4991_p5 = pneg %p4990_p2 }
  0x58   : > { %p4998_p10 = pnand %p4997_p3, %p4991_p5 }
  0x5a   : > { %5001 = shalt.err (!%p4998_p10)
}
  0x5b   : > { %4592 = dma.hbm_to_vmem [thread:$0]  (!%p5475_p6), %s6321_s22, 32, %s5479_s30, [#allocation8]  }
  0x5c   : > { %s6322_s25 = sld [smem:[#allocation37_spill]] }
  0x62   : > { %s5002_s23 = scalar_lea.hbm %s6322_s25, 16 }
  0x63   : > { %p5003_p11 = scmp.ne.s32.totalorder %s6322_s25, %s5002_s23  ;;  %p5009_p0 = scmp.lt.u32.totalorder %s5002_s23, %s6322_s25 }
  0x65   : > { %p5005_p12 = pnand %p5003_p11, %p5491_p8 }
  0x67   : > { %p5006_p13 = pneg %p5005_p12 }
  0x69   : > { %p5011_p2 = pnand %p5009_p0, %p5006_p13 }
  0x6b   : > { %5014 = shalt.err (!%p5011_p2)
}
  0x6c   : > { %s5015_s30 = scalar_lea.vmem %s5481_s10, 16  ;;  %s5022_s24 = scalar_lea.vmem %s5481_s10, 32 }
  0x6d   : > { %p5016_p5 = scmp.ne.s32.totalorder %s5481_s10, %s5015_s30  ;;  %p5023_p3 = scmp.lt.s32.totalorder %s5481_s10, %s5481_s10 }
  0x6e   : > { %p5024_p10 = scmp.lt.s32.totalorder %s5022_s24, %s5015_s30 }
  0x6f   : > { %p5018_p7 = pnand %p5016_p5, %p5491_p8 }
  0x70   : > { %p5025_p11 = por %p5024_p10, %p5023_p3 }
  0x71   : > { %p5019_p9 = pneg %p5018_p7 }
  0x73   : > { %p5026_p12 = pnand %p5025_p11, %p5019_p9 }
  0x75   : > { %5029 = shalt.err (!%p5026_p12)
}
  0x76   : > { %4598 = dma.hbm_to_vmem [thread:$0]  (!%p5475_p6), %s6322_s25, 16, %s5481_s10, [#allocation11]  }
  0x77   : > { %s5287_s19 = smov [#allocation9]   ;;  %s5288_s21 = smov [#allocation12]  }
  0x78   : > { %s730_s20 = sshll.u32 %s5287_s19, 4  ;;  %s752_s23 = sshll.u32 %s5288_s21, 4  ;;  %s731_s20 = int_to_ptr.vmem [resolvable:$true] %s730_s20  ;;  %s753_s23 = int_to_ptr.vmem [resolvable:$true] %s752_s23 }
  0x79   : > { %s6323_s1 = sld [smem:[#allocation36_spill]] }
  0x7f   : > { %s5030_s5 = scalar_lea.hbm %s6323_s1, 16 }
  0x80   : > { %p5031_p13 = scmp.ne.s32.totalorder %s6323_s1, %s5030_s5  ;;  %p5037_p5 = scmp.lt.u32.totalorder %s5030_s5, %s6323_s1 }
  0x82   : > { %p5033_p0 = pnand %p5031_p13, %p5491_p8 }
  0x84   : > { %p5034_p2 = pneg %p5033_p0 }
  0x86   : > { %p5039_p7 = pnand %p5037_p5, %p5034_p2 }
  0x88   : > { %5042 = shalt.err (!%p5039_p7)
}
  0x89   : > { %s5043_s10 = scalar_lea.vmem %s731_s20, 16  ;;  %s5050_s18 = scalar_lea.vmem %s731_s20, 32 }
  0x8a   : > { %p5044_p9 = scmp.ne.s32.totalorder %s731_s20, %s5043_s10  ;;  %p5051_p11 = scmp.lt.s32.totalorder %s731_s20, %s731_s20 }
  0x8b   : > { %p5052_p12 = scmp.lt.s32.totalorder %s5050_s18, %s5043_s10 }
  0x8c   : > { %p5046_p3 = pnand %p5044_p9, %p5491_p8 }
  0x8d   : > { %p5053_p1 = por %p5052_p12, %p5051_p11 }
  0x8e   : > { %p5047_p10 = pneg %p5046_p3 }
  0x90   : > { %p5054_p4 = pnand %p5053_p1, %p5047_p10 }
  0x92   : > { %5057 = shalt.err (!%p5054_p4)
}
  0x93   : > { %4595 = dma.hbm_to_vmem [thread:$0]  (!%p5475_p6), %s6323_s1, 16, %s731_s20, [#allocation8]  }
  0x94   : > { %s6324_s6 = sld [smem:[#allocation38_spill]] }
  0x9a   : > { %s5058_s5 = scalar_lea.hbm %s6324_s6, 16 }
  0x9b   : > { %p5059_p13 = scmp.ne.s32.totalorder %s6324_s6, %s5058_s5  ;;  %p5065_p4 = scmp.lt.u32.totalorder %s5058_s5, %s6324_s6 }
  0x9d   : > { %p5061_p0 = pnand %p5059_p13, %p5491_p8 }
  0x9f   : > { %p5062_p1 = pneg %p5061_p0 }
  0xa1   : > { %p5067_p2 = pnand %p5065_p4, %p5062_p1 }
  0xa3   : > { %5070 = shalt.err (!%p5067_p2)
}
  0xa4   : > { %s5071_s18 = scalar_lea.vmem %s753_s23, 16  ;;  %s5078_s20 = scalar_lea.vmem %s753_s23, 32 }
  0xa5   : > { %p5072_p5 = scmp.ne.s32.totalorder %s753_s23, %s5071_s18  ;;  %p5079_p3 = scmp.lt.s32.totalorder %s753_s23, %s753_s23 }
  0xa6   : > { %p5080_p10 = scmp.lt.s32.totalorder %s5078_s20, %s5071_s18 }
  0xa7   : > { %p5074_p7 = pnand %p5072_p5, %p5491_p8 }
  0xa8   : > { %p5081_p11 = por %p5080_p10, %p5079_p3 }
  0xa9   : > { %p5075_p9 = pneg %p5074_p7 }
  0xab   : > { %p5082_p12 = pnand %p5081_p11, %p5075_p9 }
  0xad   : > { %5085 = shalt.err (!%p5082_p12)
}
  0xae   : > { %4601 = dma.hbm_to_vmem [thread:$0]  (!%p5475_p6), %s6324_s6, 16, %s753_s23, [#allocation11]  }
  0xaf   : > { %s5289_s8 = smov [#allocation13]   ;;  %s6325_s11 = sld [smem:[#allocation39_spill]] }
  0xb0   : > { %s763_s26 = sshll.u32 %s5289_s8, 4  ;;  %s764_s26 = int_to_ptr.vmem [resolvable:$true] %s763_s26 }
  0xb5   : > { %s5086_s24 = scalar_lea.hbm %s6325_s11, 16 }
  0xb6   : > { %p5087_p13 = scmp.ne.s32.totalorder %s6325_s11, %s5086_s24  ;;  %p5093_p4 = scmp.lt.u32.totalorder %s5086_s24, %s6325_s11 }
  0xb8   : > { %p5089_p0 = pnand %p5087_p13, %p5491_p8 }
  0xba   : > { %p5090_p1 = pneg %p5089_p0 }
  0xbc   : > { %p5095_p2 = pnand %p5093_p4, %p5090_p1 }
  0xbe   : > { %5098 = shalt.err (!%p5095_p2)
}
  0xbf   : > { %s5099_s23 = scalar_lea.vmem %s764_s26, 16  ;;  %s5106_s19 = scalar_lea.vmem %s764_s26, 32 }
  0xc0   : > { %p5100_p5 = scmp.ne.s32.totalorder %s764_s26, %s5099_s23  ;;  %p5107_p3 = scmp.lt.s32.totalorder %s764_s26, %s764_s26 }
  0xc1   : > { %p5108_p10 = scmp.lt.s32.totalorder %s5106_s19, %s5099_s23 }
  0xc2   : > { %p5102_p7 = pnand %p5100_p5, %p5491_p8 }
  0xc3   : > { %p5109_p11 = por %p5108_p10, %p5107_p3 }
  0xc4   : > { %p5103_p9 = pneg %p5102_p7 }
  0xc6   : > { %p5110_p12 = pnand %p5109_p11, %p5103_p9 }
  0xc8   : > { %5113 = shalt.err (!%p5110_p12)
}
  0xc9   : > { %4604 = dma.hbm_to_vmem [thread:$0]  (!%p5475_p6), %s6325_s11, 16, %s764_s26, [#allocation14]  }
  0xca   : > { %s5614_s9 = sadd.s32 1, %s5280_s28   ;;  %s354_s2 = sadd.s32 1, %s5276_s7 }
  0xcb   : > { %s351_s5 = ssub.s32 %s5280_s28, %s5614_s9  ;;  %p361_p8 = scmp.ne.s32.totalorder %s5276_s7, %s5272_s3 }
  0xcc   : > { %p352_p13 = scmp.eq.s32.totalorder %s351_s5, 0  ;;  %p362_p0 = scmp.eq.s32.totalorder %s5280_s28, 0 }
  0xcd   : > { %p367_p1 = scmp.ne.s32.totalorder %s5272_s3, %s5268_s27  ;;  %p4615_p4 = scmp.lt.s32.totalorder %s5280_s28, 2 }
  0xce   : > { %s5626_s30 = scalar_select %p352_p13, %s5276_s7, %s354_s2  }
  0xcf   : > { %p363_p2 = por %p362_p0, %p361_p8  ;;  %p6327_p5 = scmp.eq.s32.totalorder %s5459_s29, 0 }
  0xd0   : > { %6326 = sst [smem:[#allocation27_spill]] %s5626_s30  ;;  %s786_s4 = sand.u32 1, %s5280_s28  }
  0xd1   : > { %p5630_p7 = por %p6327_p5, %p367_p1  ;;  %s788_s26 = sand.u32 1, %s5276_s7  }
  0xd2   : > { %s4544_s10 = smul.u32 192, %s788_s26  ;;  %p5637_p6 = pnand %p4615_p4, %p363_p2 }
  0xd3   : > { %s4545_s18 = smul.u32 3072, %s5280_s28  ;;  %s6330_s14 = sld [smem:[#allocation40_spill]] }
  0xd4   : > { %s790_s21 = scalar_lea.vmem [#allocation15], %s4544_s10  ;;  %s5648_s28 = scalar_lea.sflag [#allocation5], %s786_s4 }
  0xd5   : > { %s797_s8 = sshll.u32 %s790_s21, 4  ;;  %p5116_p3 = pneg %p5637_p6  ;;  %s5646_s8 = int_to_ptr.vmem [resolvable:$true] %s797_s8 }
  0xd9   : > { %s5644_s27 = scalar_lea.hbm %s6330_s14, %s4545_s18  ;;  %s5119_s18 = scalar_lea.hbm %s6330_s14, 6144 }
  0xda   : > { %s5114_s2 = scalar_lea.hbm %s5644_s27, 3072  ;;  %p5120_p12 = scmp.lt.u32.totalorder %s5644_s27, %s6330_s14 }
  0xdb   : > { %p5115_p9 = scmp.ne.s32.totalorder %s5644_s27, %s5114_s2  ;;  %p5121_p8 = scmp.lt.u32.totalorder %s5119_s18, %s5114_s2 }
  0xdc   : > { %p5123_p0 = scmp.lt.u32.totalorder %s5114_s2, %s5644_s27 }
  0xdd   : > { %p5117_p10 = pnand %p5116_p3, %p5115_p9  ;;  %p5122_p13 = por %p5121_p8, %p5120_p12 }
  0xdf   : > { %p5118_p11 = pneg %p5117_p10  ;;  %p5124_p1 = por %p5123_p0, %p5122_p13 }
  0xe1   : > { %p5125_p4 = pnand %p5124_p1, %p5118_p11 }
  0xe3   : > { %5128 = shalt.err (!%p5125_p4)
}
  0xe4   : > { %s5129_s4 = scalar_lea.vmem %s5646_s8, 3072  ;;  %s5290_s10 = smov [#allocation15]  }
  0xe5   : > { %p5130_p2 = scmp.ne.s32.totalorder %s5646_s8, %s5129_s4  ;;  %s5134_s21 = sshll.u32 %s5290_s10, 4  ;;  %s5135_s21 = int_to_ptr.vmem [resolvable:$false] %s5134_s21 }
  0xe6   : > { %s5136_s5 = scalar_lea.vmem %s5135_s21, 6144  ;;  %p5137_p10 = scmp.lt.s32.totalorder %s5646_s8, %s5135_s21 }
  0xe7   : > { %p5132_p5 = pnand %p5130_p2, %p5116_p3  ;;  %p5138_p12 = scmp.lt.s32.totalorder %s5136_s5, %s5129_s4 }
  0xe9   : > { %p5133_p9 = pneg %p5132_p5  ;;  %p5139_p8 = por %p5138_p12, %p5137_p10 }
  0xeb   : > { %p5140_p13 = pnand %p5139_p8, %p5133_p9 }
  0xed   : > { %5143 = shalt.err (!%p5140_p13)
}
  0xee   : > { %s5291_s2 = smov 192   ;;  %s5292_s26 = smov 12  }
  0xef   : > { %4608 = dma.hbm_to_vmem [thread:$0]  (!%p5637_p6), %s5644_s27, 3072, %s5646_s8, %s5648_s28, %s5291_s2, %s5291_s2, %s5292_s26  }
  0xf0   : > { %p6331_p3 = scmp.ne.s32.totalorder %s6317_s0, 0 }
  0xf1   : > { %p6332_p11 = scmp.eq.s32.totalorder (!%p6331_p3), %s5459_s29, 0 }
  0xf2   : > { %871 = sbr.rel (%p6331_p3) target bundleno = 4511 (0x119f), region = 116 }
  0xf9   : > { %5239 = dma.done.wait (%p6332_p11), [#allocation5], 6144   ;;  %p6333_p0 = pmov %p6332_p11 }
  0xfb   : > { %5241 = vsyncadd (%p6333_p0), [#allocation5], 4294961152  ;;  %p6334_p1 = pmov %p6333_p0 }
  0xfc   : > { %p6335_p4 = pmov %p6333_p0 }
  0xfd   : > { %5243 = dma.done.wait (%p6334_p1), [#allocation8], 48  }
  0xfe   : > { %5245 = vsyncadd (%p6335_p4), [#allocation8], 4294967248  ;;  %p6336_p2 = pmov %p6333_p0 }
  0xff   : > { %p6337_p6 = pmov %p6333_p0 }
 0x100   : > { %5247 = dma.done.wait (%p6336_p2), [#allocation11], 32  }
 0x101   : > { %5249 = vsyncadd (%p6337_p6), [#allocation11], 4294967264  ;;  %p6338_p5 = pmov %p6333_p0 }
 0x102   : > { %p6339_p9 = pmov %p6333_p0 }
 0x103   : > { %5251 = dma.done.wait (%p6338_p5), [#allocation14], 16  }
 0x104   : > { %5253 = vsyncadd (%p6339_p9), [#allocation14], 4294967280  ;;  %s897_s0 = sand.u32 1, %s5459_s29   ;;  %s899_s20 = sand.u32 1, %s5272_s3  }
 0x105   : > { %s4546_s27 = smul.u32 192, %s899_s20  ;;  %s898_s8 = scalar_lea.sflag [#allocation5], %s897_s0 }
 0x107   : > { %s5696_s28 = scalar_lea.vmem [#allocation15], %s4546_s27 }
 0x108   : > { %5255 = dma.done.wait (%p5630_p7), %s898_s8, 3072  }
 0x109   : > { %5257 = vsyncadd (%p5630_p7), %s898_s8, 4294964224  ;;  %p1006_p10 = scmp.lt.s32.totalorder %s5459_s29, 1  ;;  %s6340_s16 = sld [smem:[#allocation42_spill]] }
 0x10a   : > { %s6341_s15 = sld [smem:[#allocation41_spill]]  ;;  %s6342_s4 = sld [smem:[#allocation43_spill]] }
 0x10b   : > { %s5704_s18 = scalar_select %p1006_p10, %s5459_s29, 1 }
 0x10c   : > { %s6343_s22 = sld [smem:[#allocation44_spill]]  ;;  %s6345_s1 = sld [smem:[#allocation46_spill]] }
 0x10d   : > { %s4547_s5 = smul.u32 3, %s5704_s18  ;;  %s4237_s2 = sshll.u32 %s5704_s18, 6 }
 0x10e   : > { %s4238_s26 = sshll.u32 %s5704_s18, 8  ;;  %s4033_s27 = sshll.u32 %s5704_s18, 2 }
 0x10f   : > { %s5719_s20 = scalar_lea.vmem %s6340_s16, %s4237_s2  ;;  %s6344_s16 = sld [smem:[#allocation45_spill]] }
 0x110   : > { %s5728_s6 = scalar_lea.vmem %s6341_s15, %s4547_s5  ;;  %s1026_s10 = scalar_lea.vmem %s6342_s4, %s5704_s18 }
 0x111   : > { %s6346_s11 = sld [smem:[#allocation47_spill]]  ;;  %p6348_p7 = scmp.ne.s32.totalorder %s5459_s29, 0 }
 0x112   : > { %s1029_s25 = scalar_lea.vmem %s6343_s22, %s5704_s18  ;;  %s5748_s5 = scalar_lea.vmem %s6345_s1, %s4033_s27  ;;  %v4680_v0 = vld [vmem:[#allocation4 + $0x40] sm:$0xff] (!%p6348_p7)   ;;  %v4684_v4 = vld [vmem:[#allocation4 + $0x48] sm:$0xff] (!%p6348_p7)   ;;  %v4688_v8 = vld [vmem:[#allocation4 + $0x50] sm:$0xff] (!%p6348_p7)  }
 0x113   : > { %s6347_s22 = sld [smem:[#allocation48_spill]]  ;;  %1051 = sbr.rel (%p6348_p7) target bundleno = 559 (0x22f), region = 148  ;;  %v4681_v1 = vld [vmem:[#allocation4] sm:$0xff] (!%p6348_p7)   ;;  %4240 = vmatprep.subr.bf16.mxu0 (!%p6348_p7), %v4680_v0  ;;  %v4685_v5 = vld [vmem:[#allocation4 + $0x8] sm:$0xff] (!%p6348_p7)   ;;  %v4689_v9 = vld [vmem:[#allocation4 + $0x10] sm:$0xff] (!%p6348_p7)  }
 0x114   : > { %v4682_v2 = vld [vmem:[#allocation4 + $0xc0] sm:$0xff] (!%p6348_p7)   ;;  %4241 = vmatpush3.bf16.msra.mxu0 (!%p6348_p7), %v4681_v1  ;;  %v4686_v6 = vld [vmem:[#allocation4 + $0xc8] sm:$0xff] (!%p6348_p7)   ;;  %v4690_v10 = vld [vmem:[#allocation4 + $0xd0] sm:$0xff] (!%p6348_p7)   ;;  %s6349_s23 = sld [smem:[#allocation28_spill]] (!%p6348_p7)  ;;  %s6350_s19 = sld [smem:[#allocation32_spill]] (!%p6348_p7) }
 0x115   : > { %s5742_s30 = scalar_lea.vmem %s6344_s16, %s4238_s26  ;;  %v4683_v3 = vld [vmem:[#allocation4 + $0x80] sm:$0xff] (!%p6348_p7)   ;;  %4262 = vmatprep.subr.bf16.mxu1 (!%p6348_p7), %v4682_v2  ;;  %4242 = vmatprep.subr.bf16.mxu0 (!%p6348_p7), %v4684_v4  ;;  %v4687_v7 = vld [vmem:[#allocation4 + $0x88] sm:$0xff] (!%p6348_p7)   ;;  %v4691_v11 = vld [vmem:[#allocation4 + $0x90] sm:$0xff] (!%p6348_p7)   ;;  %s6351_s14 = sld [smem:[#allocation30_spill]] (!%p6348_p7) }
 0x116   : > { %4263 = vmatpush3.bf16.msra.mxu1 (!%p6348_p7), %v4683_v3  ;;  %v4692_v12 = vld [vmem:[#allocation4 + $0x58] sm:$0xff] (!%p6348_p7)   ;;  %v4696_v16 = vld [vmem:[#allocation4 + $0x60] sm:$0xff] (!%p6348_p7)   ;;  %v4700_v20 = vld [vmem:[#allocation4 + $0x68] sm:$0xff] (!%p6348_p7)  }
 0x117   : > { %s5753_s24 = scalar_lea.vmem %s6346_s11, %s4238_s26  ;;  %4264 = vmatprep.subr.bf16.mxu1 (!%p6348_p7), %v4686_v6  ;;  %v4693_v13 = vld [vmem:[#allocation4 + $0x18] sm:$0xff] (!%p6348_p7)   ;;  %v4697_v17 = vld [vmem:[#allocation4 + $0x20] sm:$0xff] (!%p6348_p7)   ;;  %v4701_v21 = vld [vmem:[#allocation4 + $0x28] sm:$0xff] (!%p6348_p7)  }
 0x118   : > { %4243 = vmatpush3.bf16.msra.mxu0 (!%p6348_p7), %v4685_v5  ;;  %v4694_v14 = vld [vmem:[#allocation4 + $0xd8] sm:$0xff] (!%p6348_p7)   ;;  %v4698_v18 = vld [vmem:[#allocation4 + $0xe0] sm:$0xff] (!%p6348_p7)   ;;  %v4702_v22 = vld [vmem:[#allocation4 + $0xe8] sm:$0xff] (!%p6348_p7)  }
 0x119   : > { %s1046_s21 = scalar_lea.vmem %s6347_s22, %s5704_s18  ;;  %4244 = vmatprep.subr.bf16.mxu0 (!%p6348_p7), %v4688_v8  ;;  %v4695_v15 = vld [vmem:[#allocation4 + $0x98] sm:$0xff] (!%p6348_p7)   ;;  %v4699_v19 = vld [vmem:[#allocation4 + $0xa0] sm:$0xff] (!%p6348_p7)   ;;  %v4703_v23 = vld [vmem:[#allocation4 + $0xa8] sm:$0xff] (!%p6348_p7)  }
 0x11a   : > { %4265 = vmatpush3.bf16.msra.mxu1 %v4687_v7  ;;  %v4704_v24 = vld [vmem:[#allocation4 + $0x70] sm:$0xff]   ;;  %v4708_v28 = vld [vmem:[#allocation4 + $0x78] sm:$0xff]   ;;  %v1052_v31 = vld [vmem:[%s6349_s23] sm:$0xff] }
 0x11b   : > { %4266 = vmatprep.subr.bf16.mxu1 %v4690_v10  ;;  %v4705_v25 = vld [vmem:[#allocation4 + $0x30] sm:$0xff]   ;;  %v4709_v29 = vld [vmem:[#allocation4 + $0x38] sm:$0xff]   ;;  %v4038_v32 = vcombine.low %v1052_v31, %v1052_v31  ;;  %v4039_v33 = vcombine.high %v1052_v31, %v1052_v31  ;;  %v4714_v35 = vld [vmem:[#allocation4 + $0x140] sm:$0xff]  }
 0x11c   : > { %4245 = vmatpush3.bf16.msra.mxu0 %v4689_v9  ;;  %v4706_v26 = vld [vmem:[#allocation4 + $0xf0] sm:$0xff]   ;;  %v4710_v30 = vld [vmem:[#allocation4 + $0xf8] sm:$0xff]   ;;  %v1053_v36 = vld [vmem:[%s6349_s23 + $0x8] sm:$0xff] }
 0x11d   : > { %4246 = vmatprep.subr.bf16.mxu0 %v4692_v12  ;;  %v4707_v27 = vld [vmem:[#allocation4 + $0xb0] sm:$0xff]   ;;  %v4713_v34 = vld [vmem:[#allocation4 + $0xb8] sm:$0xff]   ;;  %1499 = vmatprep.mubr.bf16.mxu0 %v4039_v33  ;;  %v4040_v37 = vcombine.low %v1053_v36, %v1053_v36  ;;  %v4041_v38 = vcombine.high %v1053_v36, %v1053_v36  ;;  %v4717_v39 = vld [vmem:[#allocation4 + $0x100] sm:$0xff]  }
 0x11e   : > { %4267 = vmatpush3.bf16.msra.mxu1 %v4691_v11  ;;  %v4718_v40 = vld [vmem:[#allocation4 + $0x148] sm:$0xff]   ;;  %v4720_v42 = vld [vmem:[#allocation4 + $0x150] sm:$0xff]   ;;  %v4722_v44 = vld [vmem:[#allocation4 + $0x158] sm:$0xff]  }
 0x11f   : > { %4268 = vmatprep.subr.bf16.mxu1 %v4694_v14  ;;  %1539 = vmatprep.mubr.bf16.mxu1 %v4041_v38  ;;  %v4719_v41 = vld [vmem:[#allocation4 + $0x108] sm:$0xff]   ;;  %v4721_v43 = vld [vmem:[#allocation4 + $0x110] sm:$0xff]   ;;  %v4723_v45 = vld [vmem:[#allocation4 + $0x118] sm:$0xff]  }
 0x120   : > { %4247 = vmatpush3.bf16.msra.mxu0 %v4693_v13  ;;  %v4724_v46 = vld [vmem:[#allocation4 + $0x160] sm:$0xff]   ;;  %v1054_v48 = vld [vmem:[%s6349_s23 + $0x10] sm:$0xff]  ;;  %v4726_v49 = vld [vmem:[#allocation4 + $0x168] sm:$0xff]  }
 0x121   : > { %4248 = vmatprep.subr.bf16.mxu0 %v4696_v16  ;;  %v4725_v47 = vld [vmem:[#allocation4 + $0x120] sm:$0xff]   ;;  %v4043_v50 = vcombine.high %v1054_v48, %v1054_v48  ;;  %v4727_v51 = vld [vmem:[#allocation4 + $0x128] sm:$0xff]   ;;  %v4728_v52 = vld [vmem:[#allocation4 + $0x170] sm:$0xff]   ;;  %v4042_v56 = vcombine.low %v1054_v48, %v1054_v48 }
 0x122   : > { %4269 = vmatpush3.bf16.msra.mxu1 %v4695_v15  ;;  %v4729_v53 = vld [vmem:[#allocation4 + $0x130] sm:$0xff]   ;;  %v4730_v54 = vld [vmem:[#allocation4 + $0x178] sm:$0xff]   ;;  %v1587_v57 = vld [vmem:[%s6350_s19] sm:$0x3f] }
 0x123   : > { %4270 = vmatprep.subr.bf16.mxu1 %v4698_v18  ;;  %v4731_v55 = vld [vmem:[#allocation4 + $0x138] sm:$0xff]   ;;  %v1588_v58 = vld [vmem:[#allocation7] sm:$0x3]  ;;  %v1592_v12 = vrot.slane %v1587_v57, 2  ;;  %v1597_v13 = vrot.slane %v1587_v57, 6 }
 0x124   : > { %4249 = vmatpush3.bf16.msra.mxu0 %v4697_v17  ;;  %v1589_v59 = vadd.f32 %v1588_v58, %v1587_v57  ;;  %v4037_v61 = vld [vmem:[%s6351_s14] ss:$0 sm:$0xff] }
 0x125   : > { %4250 = vmatprep.subr.bf16.mxu0 %v4700_v20 }
 0x126   : > { %4271 = vmatpush3.bf16.msra.mxu1 %v4699_v19  ;;  %1590 = vst [vmem:[#allocation2] sm:$0x3] %v1589_v59  ;;  %1596 = vst [vmem:[#allocation2 + $0x6] sm:$0x3] %v1589_v59 }
 0x127   : > { %4272 = vmatprep.subr.bf16.mxu1 %v4702_v22 }
 0x128   : > { %4251 = vmatpush3.bf16.msra.mxu0 %v4701_v21 }
 0x129   : > { %4252 = vmatprep.subr.bf16.mxu0 %v4704_v24 }
 0x12a   : > { %4273 = vmatpush3.bf16.msra.mxu1 %v4703_v23 }
 0x12b   : > { %4274 = vmatprep.subr.bf16.mxu1 %v4706_v26 }
 0x12c   : > { %4253 = vmatpush3.bf16.msra.mxu0 %v4705_v25 }
 0x12d   : > { %4254 = vmatprep.subr.bf16.mxu0 %v4708_v28 }
 0x12e   : > { %4275 = vmatpush3.bf16.msra.mxu1 %v4707_v27 }
 0x12f   : > { %4276 = vmatprep.subr.bf16.mxu1 %v4710_v30 }
 0x130   : > { %4255 = vmatpush3.bf16.msra.mxu0 %v4709_v29 }
 0x131   : > { %4284 = vmatprep.subr.bf16.mxu0 %v4714_v35 }
 0x132   : > { %4277 = vmatpush3.bf16.msra.mxu1 %v4713_v34 }
 0x133   : > { %1500 = vmatmul.mubr.bf16.vlgmr.msra.gmra.mrb[0].mxu0 %v4038_v32 }
 0x134   : > { %4285 = vmatpush3.bf16.msra.mxu0 %v4717_v39  ;;  %1579 = vmatprep.mubr.bf16.mxu0 %v4043_v50 }
 0x135   : > { %1540 = vmatmul.mubr.bf16.vlgmr.msra.gmra.mrb[0].mxu1 %v4040_v37  ;;  %4286 = vmatprep.subr.bf16.mxu0 %v4718_v40 }
 0x138   : > { %4287 = vmatpush3.bf16.msra.mxu0 %v4719_v41 }
 0x139   : > { %4288 = vmatprep.subr.bf16.mxu0 %v4720_v42 }
 0x13c   : > { %4289 = vmatpush3.bf16.msra.mxu0 %v4721_v43 }
 0x13d   : > { %4290 = vmatprep.subr.bf16.mxu0 %v4722_v44 }
 0x140   : > { %4291 = vmatpush3.bf16.msra.mxu0 %v4723_v45 }
 0x141   : > { %4292 = vmatprep.subr.bf16.mxu0 %v4724_v46 }
 0x144   : > { %4293 = vmatpush3.bf16.msra.mxu0 %v4725_v47 }
 0x145   : > { %4294 = vmatprep.subr.bf16.mxu0 %v4726_v49 }
 0x148   : > { %4295 = vmatpush3.bf16.msra.mxu0 %v4727_v51 }
 0x149   : > { %4296 = vmatprep.subr.bf16.mxu0 %v4728_v52 }
 0x14c   : > { %4297 = vmatpush3.bf16.msra.mxu0 %v4729_v53 }
 0x14d   : > { %4298 = vmatprep.subr.bf16.mxu0 %v4730_v54 }
 0x150   : > { %4299 = vmatpush3.bf16.msra.mxu0 %v4731_v55 }
 0x153   : > { %1580 = vmatmul.mubr.bf16.vlgmr.msra.gmra.mrb[4].mxu0 %v4042_v56 }
 0x206   : > { %v4256_v60 = vpop.f32.mrb[0].mxu0 }
 0x207   : > { %v4257_v62 = vpop.f32.mrb[1].mxu0 }
 0x208   : > { %v4258_v63 = vadd.f32 %v4257_v62, %v4256_v60  ;;  %v4259_v0 = vpop.f32.mrb[2].mxu0  ;;  %v4278_v1 = vpop.f32.mrb[0].mxu1 }
 0x209   : > { %v4260_v2 = vpop.f32.mrb[3].mxu0  ;;  %v4279_v3 = vpop.f32.mrb[1].mxu1 }
 0x20a   : > { %v1502_v4 = vadd.f32 %v4258_v63, %v4037_v61  ;;  %v4280_v5 = vadd.f32 %v4279_v3, %v4278_v1  ;;  %v4281_v6 = vpop.f32.mrb[2].mxu1 }
 0x20b   : > { %v4282_v7 = vpop.f32.mrb[3].mxu1 }
 0x20c   : > { %v1542_v8 = vadd.f32 %v4280_v5, %v1502_v4 }
 0x226   : > { %v4300_v9 = vpop.f32.mrb[4].mxu0 }
 0x227   : > { %v4301_v10 = vpop.f32.mrb[5].mxu0 }
 0x228   : > { %v4302_v11 = vadd.f32 %v4301_v10, %v4300_v9  ;;  %v4303_v14 = vpop.f32.mrb[6].mxu0 }
 0x229   : > { %v4304_v15 = vpop.f32.mrb[7].mxu0 }
 0x22a   : > { %v1582_v16 = vadd.f32 %v4302_v11, %v1542_v8 }
 0x22c   : > { %v1594_v17 = vadd.f32 %v1592_v12, %v1582_v16  ;;  %v1599_v18 = vadd.f32 %v1597_v13, %v1582_v16 }
 0x22e   : > { %1595 = vst [vmem:[#allocation2 + $0x2] sm:$0xf] %v1594_v17  ;;  %1600 = vst [vmem:[#allocation2 + $0x4] sm:$0xf0] %v1599_v18 }
 0x22f PF: > { %vm1607_vm0 = vcmask 1043456   ;;  %v4764_v22 = vld [vmem:[%s5696_s28 + $0x4] ss:$12 sps:$4 sm:$0xff]   ;;  %v4766_v23 = vld [vmem:[%s5696_s28] ss:$12 sps:$4 sm:$0xff]   ;;  %v5293_v24 = vmov 0.0   ;;  %s6352_s15 = scalar_lea.vmem %s6261_s12, %s5704_s18  ;;  %s6353_s2 = scalar_lea.vmem %s6262_s13, %s5704_s18  ;;  %v1682_v10 = vlaneseq }
 0x230   : > { %4400 = vmatprep.subr.bf16.mxu1 %v5293_v24  ;;  %v4767_v25 = vld [vmem:[%s5696_s28 + $0x8] ss:$12 sps:$4 sm:$0xff]   ;;  %1825 = vmatprep.subr.bf16.mxu0 %v4764_v22  ;;  %v4770_v36 = vld [vmem:[%s5696_s28 + $0x18] ss:$12 sps:$4 sm:$0xff]   ;;  %v4771_v37 = vld [vmem:[%s5696_s28 + $0x20] ss:$12 sps:$4 sm:$0xff]  }
 0x231   : > { %v4768_v26 = vld [vmem:[%s5696_s28 + $0x1c] ss:$12 sps:$4 sm:$0xff]   ;;  %1826 = vmatpush1.bf16.msra.mxu0 %v4766_v23  ;;  %4401 = vmatpush3.bf16.msra.mxu1 %v4767_v25  ;;  %v4772_v38 = vld [vmem:[%s5696_s28 + $0x34] ss:$12 sps:$4 sm:$0xff]   ;;  %v4775_v40 = vld [vmem:[%s5696_s28 + $0x38] ss:$12 sps:$4 sm:$0xff]  }
 0x232   : > { %1827 = vmatprep.subr.bf16.mxu0 %v4768_v26  ;;  %4402 = vmatprep.subr.bf16.mxu1 %v5293_v24  ;;  %v4774_v39 = vld [vmem:[%s5696_s28 + $0x30] ss:$12 sps:$4 sm:$0xff]   ;;  %v4776_v41 = vld [vmem:[%s5696_s28 + $0x4c] ss:$12 sps:$4 sm:$0xff]   ;;  %v4778_v42 = vld [vmem:[%s5696_s28 + $0x48] ss:$12 sps:$4 sm:$0xff]  }
 0x233   : > { %v4779_v43 = vld [vmem:[%s5696_s28 + $0x50] ss:$12 sps:$4 sm:$0xff]   ;;  %v4782_v45 = vld [vmem:[%s5696_s28 + $0x60] ss:$12 sps:$4 sm:$0xff]   ;;  %v4783_v46 = vld [vmem:[%s5696_s28 + $0x68] ss:$12 sps:$4 sm:$0xff]  }
 0x234   : > { %v4780_v44 = vld [vmem:[%s5696_s28 + $0x64] ss:$12 sps:$4 sm:$0xff]   ;;  %v4784_v47 = vld [vmem:[%s5696_s28 + $0x7c] ss:$12 sps:$4 sm:$0xff]   ;;  %v4787_v49 = vld [vmem:[%s5696_s28 + $0x80] ss:$12 sps:$4 sm:$0xff]  }
 0x235   : > { %v1602_v19 = vld [vmem:[#allocation2 + $0x8] sm:$0xf]  ;;  %v1601_v21 = vld [vmem:[#allocation2] sm:$0xff]  ;;  %1828 = vmatpush1.bf16.msra.mxu0 %v4770_v36  ;;  %4403 = vmatpush3.bf16.msra.mxu1 %v4771_v37  ;;  %v5294_v51 = vmov 0   ;;  %vm5295_vm1 = vmmov 0   ;;  %v5833_v11 = vshrl.u32 %v1682_v10, 7 }
 0x236   : > { %v1608_v20 = vsel %vm1607_vm0, %v1602_v19, 0.0  ;;  %4404 = vmatprep.subr.bf16.mxu1 %v5293_v24  ;;  %1829 = vmatprep.subr.bf16.mxu0 %v4772_v38  ;;  %v4786_v48 = vld [vmem:[%s5696_s28 + $0x78] ss:$12 sps:$4 sm:$0xff]   ;;  %v4788_v50 = vld [vmem:[%s5696_s28 + $0x94] ss:$12 sps:$4 sm:$0xff]   ;;  %vm1911_vm2 = vcmask 261120  }
 0x237   : > { %1609 = vadd.xlane.f32.xlu0 %v1608_v20  ;;  %1857 = vmatprep.mubr.bf16.mxu0 %v5294_v51  ;;  %v4790_v52 = vld [vmem:[%s5696_s28 + $0x90] ss:$12 sps:$4 sm:$0xff]   ;;  %v4791_v53 = vld [vmem:[%s5696_s28 + $0x98] ss:$12 sps:$4 sm:$0xff]   ;;  %v4794_v55 = vld [vmem:[%s5696_s28 + $0xa8] ss:$12 sps:$4 sm:$0xff]  }
 0x238   : > { %4416 = vmatprep.mubr.msk.bf16.mxu1 %vm5295_vm1, %v5293_v24  ;;  %v4792_v54 = vld [vmem:[%s5696_s28 + $0xac] ss:$12 sps:$4 sm:$0xff]   ;;  %v4795_v56 = vld [vmem:[%s5696_s28 + $0xb0] ss:$12 sps:$4 sm:$0xff]   ;;  %v4092_v1 = vld [vmem:[%s6352_s15] ss:$0 sm:$0xff]  ;;  %s6360_s28 = scalar_lea.vmem %s6266_s17, %s5704_s18 }
 0x239   : > { %1830 = vmatpush1.bf16.msra.mxu0 %v4774_v39  ;;  %4405 = vmatpush3.bf16.msra.mxu1 %v4775_v40  ;;  %v4093_v5 = vld [vmem:[%s6353_s2] ss:$0 sm:$0xff]  ;;  %v1684_v12 = vsub.s32 0, %v5833_v11  ;;  %v1692_v14 = vsub.s32 2, %v5833_v11  ;;  %v1688_v15 = vsub.s32 1, %v5833_v11  ;;  %vm5851_vm3 = vmpackc.low %vm1911_vm2, %vm1911_vm2  ;;  %vm5296_vm4 = vmmov 1  }
 0x23a   : > { %4406 = vmatprep.subr.bf16.mxu1 %v5293_v24  ;;  %1831 = vmatprep.subr.bf16.mxu0 %v4776_v41  ;;  %v1680_v13 = vld [vmem:[%s5728_s6] sm:$0x7]  ;;  %vm5860_vm5 = vmpackc.low %vm1607_vm0, %vm5296_vm4  ;;  %s6358_s27 = sld [smem:[#allocation33_spill]]  ;;  %vm2007_vm6 = vcmask 93184   ;;  %vm2003_vm7 = vcmask 97280   ;;  %s5297_s11 = smov 64  }
 0x23b   : > { %1605 = vadd.xlane.f32.xlu0 %v1601_v21  ;;  %v1685_v16 = vrot.slane %v1680_v13, %v1684_v12  ;;  %v1693_v17 = vrot.slane %v1680_v13, %v1692_v14  ;;  %v1689_v20 = vrot.slane %v1680_v13, %v1688_v15  ;;  %s5298_s4 = smov 96   ;;  %vm2112_vm8 = vcmask 257024   ;;  %s5299_s14 = smov 32   ;;  %v4798_v38 = vld [vmem:[%s5719_s20 + $0x10] sm:$0xff]  }
 0x23c   : > { %vm2328_vm9 = vcmask 523520   ;;  %vm2545_vm10 = vcmask 785920   ;;  %vm2330_vm11 = vcmask 519424   ;;  %vm2762_vm12 = vcmask 1048320   ;;  %p4222_p12 = scmp.ne.s32.totalorder %s5459_s29, 1 }
 0x23d   : > { %1832 = vmatpush1.bf16.msra.mxu0 %v4778_v42  ;;  %4407 = vmatpush3.bf16.msra.mxu1 %v4779_v43  ;;  %vm2547_vm13 = vcmask 781824   ;;  %vm2764_vm14 = vcmask 1044224   ;;  %vm3660_vm15 = vcmask (!%p4222_p12), 1041408   ;;  %s6365_s1 = sld [smem:[#allocation35_spill]] (!%p4222_p12) }
 0x23e   : > { %4408 = vmatprep.subr.bf16.mxu1 %v5293_v24  ;;  %1833 = vmatprep.subr.bf16.mxu0 %v4780_v44 }
 0x240   : > { %s6359_s8 = smov %s6358_s27  ;;  %v5879_v41 = vld [vmem:[%s6358_s27 + $0x8] sm:$0xf] }
 0x241   : > { %1834 = vmatpush1.bf16.msra.mxu0 %v4782_v45  ;;  %4409 = vmatpush3.bf16.msra.mxu1 %v4783_v46  ;;  %v5884_v44 = vld [vmem:[%s6359_s8] sm:$0xff] }
 0x242   : > { %1835 = vmatprep.subr.bf16.mxu0 %v4784_v47  ;;  %4410 = vmatprep.subr.bf16.mxu1 %v5293_v24 }
 0x245   : > { %1836 = vmatpush1.bf16.msra.mxu0 %v4786_v48  ;;  %4411 = vmatpush3.bf16.msra.mxu1 %v4787_v49 }
 0x246   : > { %1837 = vmatprep.subr.bf16.mxu0 %v4788_v50  ;;  %4412 = vmatprep.subr.bf16.mxu1 %v5293_v24 }
 0x249   : > { %1838 = vmatpush1.bf16.msra.mxu0 %v4790_v52  ;;  %4413 = vmatpush3.bf16.msra.mxu1 %v4791_v53 }
 0x24a   : > { %1839 = vmatprep.subr.bf16.mxu0 %v4792_v54  ;;  %4414 = vmatprep.subr.bf16.mxu1 %v5293_v24 }
 0x24d   : > { %1840 = vmatpush1.bf16.msra.mxu0 %v4794_v55  ;;  %4415 = vmatpush3.bf16.msra.mxu1 %v4795_v56 }
 0x2c4   : > { %v1610_v27 = vpop.xlane.xlu0 %1609 }
 0x2c5   : > { %v1613_v28 = vmul.f32 0.0078125, %v1610_v27 }
 0x2c7   : > { %v5783_v31 = vsub.f32 %v1602_v19, %v1613_v28 }
 0x2c8   : > { %v1606_v29 = vpop.xlane.xlu0 %1605 }
 0x2c9   : > { %v1612_v30 = vmul.f32 0.0078125, %v1606_v29  ;;  %v1617_v34 = vmul.f32 %v5783_v31, %v5783_v31 }
 0x2cb   : > { %v5785_v32 = vsub.f32 %v1601_v21, %v1612_v30  ;;  %v1620_v35 = vsel %vm1607_vm0, %v1617_v34, 0.0 }
 0x2cd   : > { %v1616_v33 = vmul.f32 %v5785_v32, %v5785_v32 }
 0x2cf   : > { %1618 = vadd.xlane.f32.xlu1 %v1616_v33 }
 0x2d3   : > { %1621 = vadd.xlane.f32.xlu1 %v1620_v35 }
 0x35c   : > { %v1619_v57 = vpop.xlane.xlu1 %1618 }
 0x35d   : > { %v1623_v58 = vmul.f32 0.0078125, %v1619_v57 }
 0x35f   : > { %v1625_v59 = vadd.f32 1e-06, %v1623_v58 }
 0x360   : > { %v1622_v60 = vpop.xlane.xlu1 %1621 }
 0x361   : > { %4884 = vrsqrt.f32 %v1625_v59  ;;  %v1624_v61 = vmul.f32 0.0078125, %v1622_v60 }
 0x363   : > { %v1626_v62 = vadd.f32 1e-06, %v1624_v61 }
 0x365   : > { %4886 = vrsqrt.f32 %v1626_v62 }
 0x36b   : > { %v4885_v63 = vpop.eup %4884 }
 0x36c   : > { %v1629_v0 = vmul.f32 %v4885_v63, %v5785_v32 }
 0x36e   : > { %v1637_v4 = vmul.f32 %v4092_v1, %v1629_v0 }
 0x36f   : > { %v4887_v2 = vpop.eup %4886 }
 0x370   : > { %v1630_v3 = vmul.f32 %v4887_v2, %v5783_v31  ;;  %v1645_v7 = vadd.f32 %v4093_v5, %v1637_v4 }
 0x372   : > { %v1638_v6 = vmul.f32 %v4092_v1, %v1630_v3 }
 0x374   : > { %v1646_v8 = vadd.f32 %v4093_v5, %v1638_v6 }
 0x376   : > { %v1647_v9 = vpack.c.bf16 %v1646_v8, %v1645_v7 }
 0x378   : > { %1858 = vmatmul.mubr.bf16.vlgmr.msra.gmra.mrb[0].mxu0 %v1647_v9  ;;  %4417 = vmatmul.mubr.bf16.vlgmr.msra.gmra.mrb[0].mxu1 %v1647_v9 }
 0x44b   : > { %v1859_v18 = vpop.f32.mrb[0].mxu0  ;;  %v1902_v19 = vpop.f32.mrb[0].mxu1 }
 0x44c   : > { %v5845_v21 = vadd.f32 %v1859_v18, %v1685_v16  ;;  %v1861_v22 = vpop.f32.mrb[1].mxu0  ;;  %v4418_v23 = vpop.f32.mrb[1].mxu1  ;;  %v1903_v27 = vadd.f32 %v1902_v19, %v1693_v17 }
 0x44d   : > { %v1863_v25 = vpop.f32.mrb[2].mxu0  ;;  %v1905_v26 = vpop.f32.mrb[2].mxu1  ;;  %v1862_v31 = vadd.f32 %v1861_v22, %v1689_v20 }
 0x44e   : > { %v1906_v28 = vadd.f32 %v1905_v26, %v1693_v17  ;;  %v1865_v29 = vpop.f32.mrb[3].mxu0  ;;  %v4419_v30 = vpop.f32.mrb[3].mxu1  ;;  %4424 = vmatprep.mubr.msk.f32.mxu0 %vm1911_vm2, %v5845_v21  ;;  %v5870_v39 = vadd.f32 %v1863_v25, %v1685_v16 }
 0x44f   : > { %v1866_v32 = vadd.f32 %v1865_v29, %v1689_v20 }
 0x450   : > { %v4502_v34 = vpack.c.bf16 %v1906_v28, %v1903_v27  ;;  %v5855_v35 = vpack.i.bf16 %v1906_v28, %v1903_v27 }
 0x451   : > { %v4496_v36 = vpack.c.bf16 %v1866_v32, %v1862_v31  ;;  %v5857_v37 = vpack.i.bf16 %v1866_v32, %v1862_v31 }
 0x453   : > { %4498 = vmatprep.subr.msk.bf16.mxu0 %vm5851_vm3, %v4496_v36 }
 0x454   : > { %4501 = vmatpush3.bf16.xpose.msk.msra.mxu0 %vm5851_vm3, %v4496_v36 }
 0x455   : > { %4504 = vmatprep.subr.msk.bf16.mxu0 %vm5860_vm5, %v4502_v34 }
 0x45b   : > { %4425 = vmatmul.mubr.msk.f32.vlgmr.msra.gmra.mrb[4].mxu0 %vm1911_vm2, %v5870_v39 }
 0x45c   : > { %4507 = vmatpush3.bf16.msk.msra.mxu0 %vm5860_vm5, %v4502_v34 }
 0x52e   : > { %v4426_v40 = vpop.f32.mrb[4].mxu0 }
 0x52f   : > { %v2000_v42 = vmul.f32 0.17677669, %v4426_v40  ;;  %v1990_v43 = vpop.f32.mrb[5].mxu0 }
 0x530   : > { %v1999_v45 = vmul.f32 0.17677669, %v1990_v43 }
 0x531   : > { %v2002_v46 = vadd.f32 %v2000_v42, %v5879_v41 }
 0x532   : > { %v2001_v47 = vadd.f32 %v1999_v45, %v5884_v44 }
 0x533   : > { %v2008_v48 = vsel %vm2007_vm6, %v2002_v46, -inf }
 0x534   : > { %2009 = vmax.xlane.f32.xlu1 %v2008_v48  ;;  %v2004_v49 = vsel %vm2003_vm7, %v2001_v47, -inf }
 0x535   : > { %2005 = vmax.xlane.f32.xlu0 %v2004_v49 }
 0x5c1   : > { %v2010_v50 = vpop.xlane.xlu1 %2009 }
 0x5c2   : > { %v2012_v52 = vsub.f32 %v2002_v46, %v2010_v50  ;;  %v2006_v53 = vpop.xlane.xlu0 %2005 }
 0x5c3   : > { %v2011_v54 = vsub.f32 %v2001_v47, %v2006_v53 }
 0x5c4   : > { %v2015_v55 = vmul.f32 1.442695, %v2012_v52 }
 0x5c5   : > { %v2013_v56 = vmul.f32 1.442695, %v2011_v54 }
 0x5c6   : > { %4888 = vpow2.f32 %v2015_v55 }
 0x5c7   : > { %4890 = vpow2.f32 %v2013_v56 }
 0x5d0   : > { %v4889_v57 = vpop.eup %4888 }
 0x5d1   : > { %v4891_v58 = vpop.eup %4890  ;;  %v2020_v59 = vsel %vm2007_vm6, %v4889_v57, 0.0 }
 0x5d2   : > { %2021 = vadd.xlane.f32.xlu1 %v2020_v59  ;;  %v2017_v60 = vsel %vm2003_vm7, %v4891_v58, 0.0 }
 0x5d3   : > { %2018 = vadd.xlane.f32.xlu0 %v2017_v60 }
 0x5e3   : > { %4740 = vrot.lane.b32.xlu1 %v5857_v37, %s5297_s11 }
 0x5e7   : > { %2114 = vrot.lane.b32.xlu1 %v5845_v21, %s5298_s4 }
 0x5e9   : > { %4735 = vrot.lane.b32.xlu0 %v5857_v37, %s5298_s4 }
 0x5eb   : > { %2116 = vrot.lane.b32.xlu1 %v5870_v39, %s5298_s4 }
 0x5ed   : > { %2332 = vrot.lane.b32.xlu0 %v5845_v21, %s5297_s11 }
 0x5ef   : > { %2334 = vrot.lane.b32.xlu1 %v5870_v39, %s5297_s11 }
 0x65f   : > { %v2022_v61 = vpop.xlane.xlu1 %2021 }
 0x660   : > { %4892 = vrcp.f32 %v2022_v61  ;;  %v2019_v62 = vpop.xlane.xlu0 %2018 }
 0x661   : > { %4894 = vrcp.f32 %v2019_v62 }
 0x663   : > { %v4741_v3 = vpop.permute.xlu1 %4740 }
 0x664   : > { %v4736_v63 = vpop.permute.xlu0 %4735  ;;  %v4743_v6 = vunpack.i.h.bf16 %v4741_v3  ;;  %v4742_v7 = vunpack.i.l.bf16 %v4741_v3 }
 0x665   : > { %v4738_v0 = vunpack.i.h.bf16 %v4736_v63  ;;  %v4737_v1 = vunpack.i.l.bf16 %v4736_v63 }
 0x666   : > { %v4520_v10 = vpack.c.bf16 %v4743_v6, %v4742_v7 }
 0x667   : > { %v4508_v2 = vpack.c.bf16 %v4738_v0, %v4737_v1  ;;  %v2115_v13 = vpop.permute.xlu1 %2114 }
 0x668   : > { %v2333_v17 = vpop.permute.xlu0 %2332 }
 0x669   : > { %4510 = vmatprep.subr.msk.bf16.mxu0 %vm5851_vm3, %v4508_v2 }
 0x66a   : > { %v4893_v4 = vpop.eup %4892 }
 0x66b   : > { %v4895_v5 = vpop.eup %4894  ;;  %v2026_v9 = vmul.f32 %v4893_v4, %v4889_v57  ;;  %v2117_v16 = vpop.permute.xlu1 %2116 }
 0x66c   : > { %v2025_v8 = vmul.f32 %v4895_v5, %v4891_v58 }
 0x66e   : > { %4431 = vmatprep.mubr.msk.f32.mxu0 %vm2003_vm7, %v2025_v8 }
 0x66f   : > { %4432 = vmatmul.mubr.msk.f32.vlgmr.msra.gmra.mrb[6].mxu0 %vm2003_vm7, %v2026_v9  ;;  %v2335_v18 = vpop.permute.xlu1 %2334 }
 0x670   : > { %4513 = vmatpush3.bf16.xpose.msk.msra.mxu0 %vm5851_vm3, %v4508_v2  ;;  %4438 = vmatprep.mubr.msk.f32.mxu0 %vm1911_vm2, %v2115_v13 }
 0x671   : > { %4522 = vmatprep.subr.msk.bf16.mxu0 %vm5851_vm3, %v4520_v10 }
 0x677   : > { %4439 = vmatmul.mubr.msk.f32.vlgmr.msra.gmra.mrb[8].mxu0 %vm1911_vm2, %v2117_v16 }
 0x678   : > { %4525 = vmatpush3.bf16.xpose.msk.msra.mxu0 %vm5851_vm3, %v4520_v10  ;;  %4452 = vmatprep.mubr.msk.f32.mxu0 %vm1911_vm2, %v2333_v17 }
 0x67f   : > { %4453 = vmatmul.mubr.msk.f32.vlgmr.msra.gmra.mrb[10].mxu0 %vm1911_vm2, %v2335_v18 }
 0x742   : > { %v4433_v19 = vpop.f32.mrb[6].mxu0 }
 0x743   : > { %2113 = vst.msk [vmem:[#allocation3 + $0x8] sm:$0xf] %vm2112_vm8, %v4433_v19  ;;  %v2102_v20 = vpop.f32.mrb[7].mxu0 }
 0x744   : > { %2111 = vst.msk [vmem:[#allocation3] sm:$0xff] %vm1911_vm2, %v2102_v20 }
 0x74a   : > { %v4440_v22 = vpop.f32.mrb[8].mxu0 }
 0x74b   : > { %v2196_v23 = vpop.f32.mrb[9].mxu0  ;;  %v2206_v34 = vmul.f32 0.17677669, %v4440_v22 }
 0x74c   : > { %v2205_v57 = vmul.f32 0.17677669, %v2196_v23 }
 0x74d   : > { %v2208_v36 = vadd.f32 %v2206_v34, %v5879_v41 }
 0x74e   : > { %v2207_v58 = vadd.f32 %v2205_v57, %v5884_v44 }
 0x74f   : > { %v2212_v40 = vsel %vm2007_vm6, %v2208_v36, -inf }
 0x750   : > { %v2209_v59 = vsel %vm2003_vm7, %v2207_v58, -inf }
 0x752   : > { %v4454_v25 = vpop.f32.mrb[10].mxu0 }
 0x753   : > { %v2424_v26 = vmul.f32 0.17677669, %v4454_v25  ;;  %v2414_v27 = vpop.f32.mrb[11].mxu0 }
 0x754   : > { %v2423_v28 = vmul.f32 0.17677669, %v2414_v27 }
 0x755   : > { %v2426_v29 = vadd.f32 %v2424_v26, %v5879_v41 }
 0x756   : > { %v2425_v30 = vadd.f32 %v2423_v28, %v5884_v44 }
 0x757   : > { %v2430_v31 = vsel %vm2007_vm6, %v2426_v29, -inf }
 0x758   : > { %2431 = vmax.xlane.f32.xlu1 %v2430_v31  ;;  %v2427_v32 = vsel %vm2003_vm7, %v2425_v30, -inf }
 0x759   : > { %2428 = vmax.xlane.f32.xlu0 %v2427_v32 }
 0x769   : > { %4750 = vrot.lane.b32.xlu1 %v5857_v37, %s5299_s14 }
 0x76d   : > { %2549 = vrot.lane.b32.xlu1 %v5845_v21, %s5299_s14 }
 0x771   : > { %2551 = vrot.lane.b32.xlu1 %v5870_v39, %s5299_s14 }
 0x795   : > { %2213 = vmax.xlane.f32.xlu1 %v2212_v40 }
 0x7e5   : > { %v2432_v42 = vpop.xlane.xlu1 %2431 }
 0x7e6   : > { %v2434_v43 = vsub.f32 %v2426_v29, %v2432_v42  ;;  %v2429_v45 = vpop.xlane.xlu0 %2428 }
 0x7e7   : > { %v2433_v46 = vsub.f32 %v2425_v30, %v2429_v45 }
 0x7e8   : > { %v2437_v47 = vmul.f32 1.442695, %v2434_v43 }
 0x7e9   : > { %v2435_v48 = vmul.f32 1.442695, %v2433_v46  ;;  %v4751_v50 = vpop.permute.xlu1 %4750 }
 0x7ea   : > { %4896 = vpow2.f32 %v2437_v47  ;;  %v4753_v1 = vunpack.i.h.bf16 %v4751_v50  ;;  %v4752_v2 = vunpack.i.l.bf16 %v4751_v50 }
 0x7eb   : > { %4898 = vpow2.f32 %v2435_v48 }
 0x7ec   : > { %v4532_v6 = vpack.c.bf16 %v4753_v1, %v4752_v2  ;;  %v4799_v1 = vld [vmem:[%s5719_s20 + $0x18] sm:$0xff]   ;;  %v4800_v2 = vld [vmem:[%s5719_s20 + $0x20] sm:$0xff]  }
 0x7ed   : > { %v2550_v52 = vpop.permute.xlu1 %2549 }
 0x7f1   : > { %v2552_v53 = vpop.permute.xlu1 %2551 }
 0x7f4   : > { %v4897_v37 = vpop.eup %4896 }
 0x7f5   : > { %v2442_v21 = vsel %vm2007_vm6, %v4897_v37, 0.0  ;;  %v4899_v49 = vpop.eup %4898 }
 0x7f6   : > { %2443 = vadd.xlane.f32.xlu0 %v2442_v21  ;;  %v2439_v39 = vsel %vm2003_vm7, %v4899_v49, 0.0 }
 0x7fa   : > { %2440 = vadd.xlane.f32.xlu0 %v2439_v39 }
 0x810   : > { %4745 = vrot.lane.b32.xlu0 %v5855_v35, %s5297_s11 }
 0x822   : > { %v2214_v54 = vpop.xlane.xlu1 %2213 }
 0x823   : > { %v2216_v55 = vsub.f32 %v2208_v36, %v2214_v54 }
 0x825   : > { %v2219_v56 = vmul.f32 1.442695, %v2216_v55 }
 0x827   : > { %4900 = vpow2.f32 %v2219_v56 }
 0x82f   : > { %2210 = vmax.xlane.f32.xlu0 %v2209_v59 }
 0x831   : > { %v5937_v60 = vpop.eup %4900 }
 0x832   : > { %v2224_v61 = vsel %vm2007_vm6, %v5937_v60, 0.0 }
 0x833   : > { %2225 = vadd.xlane.f32.xlu1 %v2224_v61 }
 0x883   : > { %v2444_v62 = vpop.xlane.xlu0 %2443 }
 0x884   : > { %4902 = vrcp.f32 %v2444_v62 }
 0x887   : > { %v2441_v63 = vpop.xlane.xlu0 %2440 }
 0x888   : > { %4904 = vrcp.f32 %v2441_v63 }
 0x88b   : > { %v4746_v0 = vpop.permute.xlu0 %4745 }
 0x88c   : > { %v4748_v3 = vunpack.i.h.bf16 %v4746_v0  ;;  %v4747_v4 = vunpack.i.l.bf16 %v4746_v0  ;;  %v4797_v0 = vld [vmem:[%s5719_s20 + $0x8] sm:$0xff]  }
 0x88e   : > { %v4526_v5 = vpack.c.bf16 %v4748_v3, %v4747_v4  ;;  %v4903_v7 = vpop.eup %4902  ;;  %v4801_v3 = vld [vmem:[%s5719_s20 + $0x28] sm:$0xff]  }
 0x88f   : > { %v2448_v10 = vmul.f32 %v4903_v7, %v4897_v37  ;;  %v4803_v7 = vld [vmem:[%s5719_s20 + $0x38] sm:$0xff]  }
 0x890   : > { %4528 = vmatprep.subr.msk.bf16.mxu0 %vm5860_vm5, %v4526_v5 }
 0x891   : > { %4531 = vmatpush3.bf16.msk.msra.mxu0 %vm5860_vm5, %v4526_v5 }
 0x892   : > { %v4905_v8 = vpop.eup %4904  ;;  %4534 = vmatprep.subr.msk.bf16.mxu0 %vm5851_vm3, %v4532_v6 }
 0x893   : > { %v2447_v9 = vmul.f32 %v4905_v8, %v4899_v49 }
 0x895   : > { %4459 = vmatprep.mubr.msk.f32.mxu0 %vm2003_vm7, %v2447_v9 }
 0x896   : > { %4460 = vmatmul.mubr.msk.f32.vlgmr.msra.gmra.mrb[12].mxu0 %vm2003_vm7, %v2448_v10 }
 0x897   : > { %4466 = vmatprep.mubr.msk.f32.mxu0 %vm1911_vm2, %v2550_v52 }
 0x89a   : > { %4537 = vmatpush3.bf16.xpose.msk.msra.mxu0 %vm5851_vm3, %v4532_v6  ;;  %v4802_v6 = vld [vmem:[%s5719_s20 + $0x30] sm:$0xff]  }
 0x8a1   : > { %4467 = vmatmul.mubr.msk.f32.vlgmr.msra.gmra.mrb[14].mxu0 %vm1911_vm2, %v2552_v53 }
 0x8a2   : > { %3172 = vmatprep.mubr.bf16.mxu0 %v5294_v51 }
 0x8bc   : > { %v2211_v16 = vpop.xlane.xlu0 %2210 }
 0x8bd   : > { %v2215_v18 = vsub.f32 %v2207_v58, %v2211_v16 }
 0x8bf   : > { %v2217_v19 = vmul.f32 1.442695, %v2215_v18 }
 0x8c0   : > { %v2226_v37 = vpop.xlane.xlu1 %2225 }
 0x8c1   : > { %4906 = vpow2.f32 %v2217_v19 }
 0x8cb   : > { %v4907_v29 = vpop.eup %4906 }
 0x8cc   : > { %v2221_v30 = vsel %vm2003_vm7, %v4907_v29, 0.0 }
 0x969   : > { %v5954_v13 = vpop.f32.mrb[12].mxu0 }
 0x96a   : > { %v2528_v17 = vpop.f32.mrb[13].mxu0 }
 0x974   : > { %v4468_v20 = vpop.f32.mrb[14].mxu0 }
 0x975   : > { %v2631_v22 = vpop.f32.mrb[15].mxu0  ;;  %v2641_v23 = vmul.f32 0.17677669, %v4468_v20 }
 0x976   : > { %v2640_v25 = vmul.f32 0.17677669, %v2631_v22 }
 0x977   : > { %v2643_v27 = vadd.f32 %v2641_v23, %v5879_v41  ;;  %v4146_v23 = vld [vmem:[%s6360_s28] ss:$0 sm:$0xff] }
 0x978   : > { %v2642_v26 = vadd.f32 %v2640_v25, %v5884_v44 }
 0x979   : > { %v2647_v28 = vsel %vm2007_vm6, %v2643_v27, -inf }
 0x97a   : > { %v2644_v33 = vsel %vm2003_vm7, %v2642_v26, -inf }
 0x97b   : > { %2645 = vmax.xlane.f32.xlu0 %v2644_v33 }
 0x97f   : > { %2648 = vmax.xlane.f32.xlu0 %v2647_v28  ;;  %v4940_v28 = vld [vmem:[#allocation2] sm:$0xff] }
 0x983   : > { %2222 = vadd.xlane.f32.xlu0 %v2221_v30 }
 0xa08   : > { %v2646_v31 = vpop.xlane.xlu0 %2645 }
 0xa09   : > { %v2650_v32 = vsub.f32 %v2642_v26, %v2646_v31  ;;  %v4941_v31 = vld [vmem:[#allocation2 + $0x8] sm:$0xf] }
 0xa0b   : > { %v2652_v34 = vmul.f32 1.442695, %v2650_v32 }
 0xa0c   : > { %v2649_v36 = vpop.xlane.xlu0 %2648 }
 0xa0d   : > { %4908 = vpow2.f32 %v2652_v34  ;;  %v2651_v40 = vsub.f32 %v2643_v27, %v2649_v36  ;;  %v4804_v36 = vld [vmem:[%s5742_s30] ss:$16 sps:$4 sm:$0xff]  }
 0xa0f   : > { %v2654_v42 = vmul.f32 1.442695, %v2651_v40  ;;  %v4806_v40 = vld [vmem:[%s5742_s30 + $0x4] ss:$16 sps:$4 sm:$0xff]  }
 0xa10   : > { %v2223_v44 = vpop.xlane.xlu0 %2222  ;;  %3140 = vmatprep.subr.bf16.mxu0 %v4806_v40  ;;  %v4853_v40 = vld [vmem:[%s5753_s24 + $0xc0] sm:$0xff]  }
 0xa11   : > { %4910 = vpow2.f32 %v2654_v42  ;;  %v4807_v42 = vld [vmem:[%s5742_s30 + $0x8] ss:$16 sps:$4 sm:$0xff]   ;;  %3141 = vmatpush1.bf16.msra.mxu0 %v4804_v36  ;;  %v4852_v36 = vld [vmem:[%s5753_s24 + $0x40] sm:$0xff]  }
 0xa12   : > { %4912 = vrcp.f32 %v2223_v44  ;;  %v4809_v44 = vld [vmem:[%s5742_s30 + $0xc] ss:$16 sps:$4 sm:$0xff]  }
 0xa13   : > { %4914 = vrcp.f32 %v2226_v37 }
 0xa17   : > { %v4909_v43 = vpop.eup %4908 }
 0xa18   : > { %v2656_v41 = vsel %vm2003_vm7, %v4909_v43, 0.0 }
 0xa19   : > { %2657 = vadd.xlane.f32.xlu0 %v2656_v41  ;;  %v4815_v41 = vld [vmem:[%s5742_s30 + $0x2c] ss:$16 sps:$4 sm:$0xff]  }
 0xa1b   : > { %v4911_v45 = vpop.eup %4910 }
 0xa1c   : > { %v4913_v46 = vpop.eup %4912  ;;  %v2659_v47 = vsel %vm2007_vm6, %v4911_v45, 0.0 }
 0xa1d   : > { %2660 = vadd.xlane.f32.xlu1 %v2659_v47  ;;  %v2229_v48 = vmul.f32 %v4913_v46, %v4907_v29  ;;  %v4915_v54 = vpop.eup %4914  ;;  %v4813_v46 = vld [vmem:[%s5742_s30 + $0x28] ss:$16 sps:$4 sm:$0xff]  }
 0xa1e   : > { %v2230_v58 = vmul.f32 %v4915_v54, %v5937_v60  ;;  %v4796_v60 = vld [vmem:[%s5719_s20] sm:$0xff]  }
 0xa1f   : > { %4445 = vmatprep.mubr.msk.f32.mxu1 %vm2003_vm7, %v2229_v48  ;;  %v4818_v54 = vld [vmem:[%s5742_s30 + $0x44] ss:$16 sps:$4 sm:$0xff]  }
 0xa2e   : > { %4760 = vrot.lane.b32.xlu1 %v5855_v35, %s5299_s14 }
 0xa2f   : > { %4755 = vrot.lane.b32.xlu0 %v5855_v35, %s5298_s4 }
 0xa33   : > { %2539 = vrot.lane.b32.xlu0 %v2528_v17, %s5297_s11 }
 0xaa6   : > { %v2658_v21 = vpop.xlane.xlu0 %2657 }
 0xaa7   : > { %4916 = vrcp.f32 %v2658_v21 }
 0xaaa   : > { %v2661_v49 = vpop.xlane.xlu1 %2660  ;;  %v4756_v39 = vpop.permute.xlu0 %4755 }
 0xaab   : > { %4918 = vrcp.f32 %v2661_v49  ;;  %v4758_v50 = vunpack.i.h.bf16 %v4756_v39  ;;  %v4757_v52 = vunpack.i.l.bf16 %v4756_v39 }
 0xaad   : > { %v4514_v53 = vpack.c.bf16 %v4758_v50, %v4757_v52 }
 0xaae   : > { %v4761_v55 = vpop.permute.xlu1 %4760  ;;  %v2540_v16 = vpop.permute.xlu0 %2539 }
 0xaaf   : > { %v4763_v56 = vunpack.i.h.bf16 %v4761_v55  ;;  %v4762_v57 = vunpack.i.l.bf16 %v4761_v55  ;;  %4516 = vmatprep.subr.msk.bf16.mxu1 %vm5860_vm5, %v4514_v53  ;;  %v4821_v55 = vld [vmem:[%s5742_s30 + $0x4c] ss:$16 sps:$4 sm:$0xff]  }
 0xab0   : > { %4519 = vmatpush3.bf16.msk.msra.mxu1 %vm5860_vm5, %v4514_v53 }
 0xab1   : > { %v4917_v35 = vpop.eup %4916  ;;  %v4538_v59 = vpack.c.bf16 %v4763_v56, %v4762_v57  ;;  %v4816_v56 = vld [vmem:[%s5742_s30 + $0x40] ss:$16 sps:$4 sm:$0xff]   ;;  %v4819_v57 = vld [vmem:[%s5742_s30 + $0x48] ss:$16 sps:$4 sm:$0xff]  }
 0xab2   : > { %v2664_v61 = vmul.f32 %v4917_v35, %v4909_v43  ;;  %v4812_v43 = vld [vmem:[%s5742_s30 + $0x24] ss:$16 sps:$4 sm:$0xff]  }
 0xab3   : > { %4446 = vmatmul.mubr.msk.f32.vlgmr.msra.gmra.mrb[4].mxu1 %vm2003_vm7, %v2230_v58  ;;  %4540 = vmatprep.subr.msk.bf16.mxu1 %vm5860_vm5, %v4538_v59  ;;  %v4824_v35 = vld [vmem:[%s5742_s30 + $0x64] ss:$16 sps:$4 sm:$0xff]   ;;  %v4827_v58 = vld [vmem:[%s5742_s30 + $0x6c] ss:$16 sps:$4 sm:$0xff]  }
 0xab4   : > { %4543 = vmatpush3.bf16.msk.msra.mxu1 %vm5860_vm5, %v4538_v59  ;;  %4473 = vmatprep.mubr.msk.f32.mxu1 %vm2003_vm7, %v2664_v61  ;;  %v4822_v59 = vld [vmem:[%s5742_s30 + $0x60] ss:$16 sps:$4 sm:$0xff]   ;;  %v4825_v61 = vld [vmem:[%s5742_s30 + $0x68] ss:$16 sps:$4 sm:$0xff]  }
 0xab5   : > { %v4919_v62 = vpop.eup %4918  ;;  %4476 = vmatprep.subr.bf16.mxu1 %v5293_v24  ;;  %3142 = vmatprep.subr.bf16.mxu0 %v4812_v43  ;;  %v4856_v43 = vld [vmem:[%s5753_s24 + $0x48] sm:$0xff]  }
 0xab6   : > { %v2665_v63 = vmul.f32 %v4919_v62, %v4911_v45  ;;  %v4810_v45 = vld [vmem:[%s5742_s30 + $0x20] ss:$16 sps:$4 sm:$0xff]   ;;  %v4830_v62 = vld [vmem:[%s5742_s30 + $0x84] ss:$16 sps:$4 sm:$0xff]  }
 0xab7   : > { %3143 = vmatpush1.bf16.msra.mxu0 %v4810_v45  ;;  %v4858_v45 = vld [vmem:[%s5753_s24 + $0x8] sm:$0xff]  }
 0xab8   : > { %4474 = vmatmul.mubr.msk.f32.vlgmr.msra.gmra.mrb[6].mxu1 %vm2003_vm7, %v2665_v63  ;;  %3144 = vmatprep.subr.bf16.mxu0 %v4818_v54  ;;  %v4833_v63 = vld [vmem:[%s5742_s30 + $0x8c] ss:$16 sps:$4 sm:$0xff]   ;;  %v4869_v54 = vld [vmem:[%s5753_s24 + $0xe0] sm:$0xff]  }
 0xab9   : > { %4492 = vmatprep.mubr.msk.bf16.mxu1 %vm5295_vm1, %v5293_v24  ;;  %4477 = vmatpush3.bf16.msra.mxu1 %v4796_v60  ;;  %v4828_v60 = vld [vmem:[%s5742_s30 + $0x80] ss:$16 sps:$4 sm:$0xff]  }
 0xaba   : > { %4478 = vmatprep.subr.bf16.mxu1 %v5293_v24 }
 0xabb   : > { %3145 = vmatpush1.bf16.msra.mxu0 %v4816_v56  ;;  %v4871_v56 = vld [vmem:[%s5753_s24 + $0xa0] sm:$0xff]  }
 0xabc   : > { %3146 = vmatprep.subr.bf16.mxu0 %v4824_v35  ;;  %v4873_v35 = vld [vmem:[%s5753_s24 + $0xe8] sm:$0xff]  }
 0xabd   : > { %4479 = vmatpush3.bf16.msra.mxu1 %v4797_v0  ;;  %v4831_v0 = vld [vmem:[%s5742_s30 + $0x88] ss:$16 sps:$4 sm:$0xff]  }
 0xabe   : > { %4480 = vmatprep.subr.bf16.mxu1 %v5293_v24 }
 0xabf   : > { %3147 = vmatpush1.bf16.msra.mxu0 %v4822_v59  ;;  %v4875_v59 = vld [vmem:[%s5753_s24 + $0xa8] sm:$0xff]  }
 0xac0   : > { %3148 = vmatprep.subr.bf16.mxu0 %v4830_v62  ;;  %v4877_v62 = vld [vmem:[%s5753_s24 + $0xf0] sm:$0xff]  }
 0xac1   : > { %4481 = vmatpush3.bf16.msra.mxu1 %v4798_v38  ;;  %v4836_v38 = vld [vmem:[%s5742_s30 + $0xa4] ss:$16 sps:$4 sm:$0xff]  }
 0xac2   : > { %4482 = vmatprep.subr.bf16.mxu1 %v5293_v24 }
 0xac3   : > { %3149 = vmatpush1.bf16.msra.mxu0 %v4828_v60  ;;  %v4879_v60 = vld [vmem:[%s5753_s24 + $0xb0] sm:$0xff]  }
 0xac4   : > { %3150 = vmatprep.subr.bf16.mxu0 %v4836_v38  ;;  %v4881_v38 = vld [vmem:[%s5753_s24 + $0xf8] sm:$0xff]  }
 0xac5   : > { %4483 = vmatpush3.bf16.msra.mxu1 %v4799_v1  ;;  %v4839_v1 = vld [vmem:[%s5742_s30 + $0xac] ss:$16 sps:$4 sm:$0xff]  }
 0xac6   : > { %4484 = vmatprep.subr.bf16.mxu1 %v5293_v24 }
 0xac9   : > { %4485 = vmatpush3.bf16.msra.mxu1 %v4800_v2  ;;  %v4834_v2 = vld [vmem:[%s5742_s30 + $0xa0] ss:$16 sps:$4 sm:$0xff]  }
 0xaca   : > { %4486 = vmatprep.subr.bf16.mxu1 %v5293_v24  ;;  %3151 = vmatpush1.bf16.msra.mxu0 %v4834_v2  ;;  %v4883_v2 = vld [vmem:[%s5753_s24 + $0xb8] sm:$0xff]  }
 0xacd   : > { %4487 = vmatpush3.bf16.msra.mxu1 %v4801_v3  ;;  %v4837_v3 = vld [vmem:[%s5742_s30 + $0xa8] ss:$16 sps:$4 sm:$0xff]  }
 0xace   : > { %4488 = vmatprep.subr.bf16.mxu1 %v5293_v24 }
 0xad1   : > { %4489 = vmatpush3.bf16.msra.mxu1 %v4802_v6  ;;  %v4840_v6 = vld [vmem:[%s5742_s30 + $0xc0] ss:$16 sps:$4 sm:$0xff]  }
 0xad2   : > { %4490 = vmatprep.subr.bf16.mxu1 %v5293_v24 }
 0xad5   : > { %4491 = vmatpush3.bf16.msra.mxu1 %v4803_v7  ;;  %v4843_v7 = vld [vmem:[%s5742_s30 + $0xc8] ss:$16 sps:$4 sm:$0xff]  }
 0xad6   : > { %3183 = vmatprep.subr.bf16.mxu1 %v4809_v44  ;;  %v4855_v44 = vld [vmem:[%s5753_s24 + $0x80] sm:$0xff]  }
 0xb86   : > { %v4447_v4 = vpop.f32.mrb[4].mxu1 }
 0xb87   : > { %v2311_v5 = vpop.f32.mrb[5].mxu1 }
 0xb88   : > { %2322 = vrot.lane.b32.xlu1 %v2311_v5, %s5299_s14  ;;  %v4845_v5 = vld [vmem:[%s5742_s30 + $0xcc] ss:$16 sps:$4 sm:$0xff]  }
 0xb8b   : > { %v4475_v8 = vpop.f32.mrb[6].mxu1 }
 0xb8c   : > { %2324 = vrot.lane.b32.xlu1 %v4447_v4, %s5299_s14  ;;  %v2745_v9 = vpop.f32.mrb[7].mxu1  ;;  %v4842_v4 = vld [vmem:[%s5742_s30 + $0xc4] ss:$16 sps:$4 sm:$0xff]  }
 0xb8d   : > { %2756 = vrot.lane.b32.xlu0 %v2745_v9, %s5298_s4  ;;  %3152 = vmatprep.subr.bf16.mxu0 %v4842_v4  ;;  %v4851_v9 = vld [vmem:[%s5742_s30 + $0xec] ss:$16 sps:$4 sm:$0xff]   ;;  %v2974_v4 = vsub.s32 3, %v5833_v11 }
 0xb8e   : > { %3153 = vmatpush1.bf16.msra.mxu0 %v4840_v6 }
 0xb90   : > { %2541 = vrot.lane.b32.xlu1 %v5954_v13, %s5297_s11 }
 0xb94   : > { %2758 = vrot.lane.b32.xlu1 %v4475_v8, %s5298_s4  ;;  %v4848_v8 = vld [vmem:[%s5742_s30 + $0xe4] ss:$16 sps:$4 sm:$0xff]  }
 0xb95   : > { %3154 = vmatprep.subr.bf16.mxu0 %v4848_v8 }
 0xbfa   : > { %v2323_v10 = vpop.permute.xlu1 %2322 }
 0xbfb   : > { %2329 = vst.msk [vmem:[#allocation3] sm:$0xff] %vm2328_vm9, %v2323_v10  ;;  %v4846_v10 = vld [vmem:[%s5742_s30 + $0xe0] ss:$16 sps:$4 sm:$0xff]  }
 0xbfc   : > { %2546 = vst.msk [vmem:[#allocation3] sm:$0xff] %vm2545_vm10, %v2540_v16  ;;  %v4849_v16 = vld [vmem:[%s5742_s30 + $0xe8] ss:$16 sps:$4 sm:$0xff]   ;;  %3155 = vmatpush1.bf16.msra.mxu0 %v4846_v10 }
 0xbfd   : > { %4356 = vmatprep.subr.bf16.mxu0 %v4852_v36 }
 0xbfe   : > { %v2325_v24 = vpop.permute.xlu1 %2324 }
 0xbff   : > { %2331 = vst.msk [vmem:[#allocation3 + $0x8] sm:$0xf] %vm2330_vm11, %v2325_v24  ;;  %v2757_v17 = vpop.permute.xlu0 %2756 }
 0xc00   : > { %2763 = vst.msk [vmem:[#allocation3] sm:$0xff] %vm2762_vm12, %v2757_v17 }
 0xc02   : > { %v2542_v18 = vpop.permute.xlu1 %2541 }
 0xc03   : > { %2548 = vst.msk [vmem:[#allocation3 + $0x8] sm:$0xf] %vm2547_vm13, %v2542_v18 }
 0xc06   : > { %v2759_v13 = vpop.permute.xlu1 %2758 }
 0xc07   : > { %2765 = vst.msk [vmem:[#allocation3 + $0x8] sm:$0xf] %vm2764_vm14, %v2759_v13  ;;  %v2766_v19 = vld [vmem:[#allocation3] sm:$0xff] }
 0xc0e   : > { %v2767_v20 = vld [vmem:[#allocation3 + $0x8] sm:$0xf] }
 0xc0f   : > { %v2768_v22 = vpack.c.bf16 %v2767_v20, %v2766_v19 }
 0xc11   : > { %4493 = vmatmul.mubr.bf16.vlgmr.msra.gmra.mrb[8].mxu1 %v2768_v22 }
 0xc12   : > { %3215 = vmatprep.mubr.bf16.mxu1 %v5294_v51  ;;  %3184 = vmatpush1.bf16.msra.mxu1 %v4807_v42  ;;  %v4854_v42 = vld [vmem:[%s5753_s24] sm:$0xff]  }
 0xc13   : > { %3185 = vmatprep.subr.bf16.mxu1 %v4815_v41  ;;  %v4857_v41 = vld [vmem:[%s5753_s24 + $0xc8] sm:$0xff]  }
 0xc16   : > { %3186 = vmatpush1.bf16.msra.mxu1 %v4813_v46  ;;  %v4859_v46 = vld [vmem:[%s5753_s24 + $0x88] sm:$0xff]  }
 0xc17   : > { %3187 = vmatprep.subr.bf16.mxu1 %v4821_v55  ;;  %v4870_v55 = vld [vmem:[%s5753_s24 + $0x20] sm:$0xff]  }
 0xc1a   : > { %3188 = vmatpush1.bf16.msra.mxu1 %v4819_v57  ;;  %v4872_v57 = vld [vmem:[%s5753_s24 + $0x68] sm:$0xff]  }
 0xc1b   : > { %3189 = vmatprep.subr.bf16.mxu1 %v4827_v58  ;;  %v4874_v58 = vld [vmem:[%s5753_s24 + $0x28] sm:$0xff]  }
 0xc1e   : > { %3190 = vmatpush1.bf16.msra.mxu1 %v4825_v61  ;;  %v4876_v61 = vld [vmem:[%s5753_s24 + $0x70] sm:$0xff]  }
 0xc1f   : > { %3191 = vmatprep.subr.bf16.mxu1 %v4833_v63  ;;  %v4878_v63 = vld [vmem:[%s5753_s24 + $0x30] sm:$0xff]  }
 0xc22   : > { %3192 = vmatpush1.bf16.msra.mxu1 %v4831_v0  ;;  %v4880_v0 = vld [vmem:[%s5753_s24 + $0x78] sm:$0xff]  }
 0xc23   : > { %3193 = vmatprep.subr.bf16.mxu1 %v4839_v1  ;;  %v4882_v1 = vld [vmem:[%s5753_s24 + $0x38] sm:$0xff]  }
 0xc26   : > { %3194 = vmatpush1.bf16.msra.mxu1 %v4837_v3  ;;  %v2958_v3 = vld [vmem:[%s5748_s5] sm:$0xf] }
 0xc27   : > { %3195 = vmatprep.subr.bf16.mxu1 %v4845_v5  ;;  %v2963_v5 = vrot.slane %v2958_v3, %v1684_v12  ;;  %v2971_v6 = vrot.slane %v2958_v3, %v1692_v14  ;;  %v2975_v8 = vrot.slane %v2958_v3, %v2974_v4 }
 0xc2a   : > { %3196 = vmatpush1.bf16.msra.mxu1 %v4843_v7  ;;  %v2967_v7 = vrot.slane %v2958_v3, %v1688_v15 }
 0xc2b   : > { %3197 = vmatprep.subr.bf16.mxu1 %v4851_v9 }
 0xc2e   : > { %3198 = vmatpush1.bf16.msra.mxu1 %v4849_v16 }
 0xc2f   : > { %4378 = vmatprep.subr.bf16.mxu1 %v4853_v40 }
 0xce4   : > { %v2874_v25 = vpop.f32.mrb[8].mxu1 }
 0xce5   : > { %v2875_v26 = vadd.f32 %v4146_v23, %v2874_v25  ;;  %v4494_v33 = vpop.f32.mrb[9].mxu1  ;;  %v4155_v25 = vld [vmem:[%s1026_s10] ss:$0 sm:$0xff] }
 0xce6   : > { %v2877_v27 = vpop.f32.mrb[10].mxu1 }
 0xce7   : > { %v6011_v29 = vadd.f32 %v4940_v28, %v2875_v26  ;;  %v2878_v30 = vadd.f32 %v4146_v23, %v2877_v27  ;;  %v4495_v51 = vpop.f32.mrb[11].mxu1  ;;  %v4156_v28 = vld [vmem:[%s1029_s25] ss:$0 sm:$0xff] }
 0xce9   : > { %v6013_v32 = vadd.f32 %v4941_v31, %v2878_v30  ;;  %2885 = vadd.xlane.f32.xlu1 %v6011_v29 }
 0xceb   : > { %v2887_v34 = vsel %vm1607_vm0, %v6013_v32, 0.0 }
 0xcec   : > { %2888 = vadd.xlane.f32.xlu0 %v2887_v34 }
 0xd76   : > { %v2886_v47 = vpop.xlane.xlu1 %2885 }
 0xd77   : > { %v2890_v48 = vmul.f32 0.0078125, %v2886_v47  ;;  %v4860_v47 = vld [vmem:[%s5753_s24 + $0x50] sm:$0xff]  }
 0xd79   : > { %v6027_v37 = vsub.f32 %v6011_v29, %v2890_v48  ;;  %v2889_v21 = vpop.xlane.xlu0 %2888  ;;  %v4861_v48 = vld [vmem:[%s5753_s24 + $0xd0] sm:$0xff]  }
 0xd7a   : > { %v2891_v49 = vmul.f32 0.0078125, %v2889_v21  ;;  %v4863_v21 = vld [vmem:[%s5753_s24 + $0x90] sm:$0xff]  }
 0xd7b   : > { %v2894_v39 = vmul.f32 %v6027_v37, %v6027_v37 }
 0xd7c   : > { %v6032_v50 = vsub.f32 %v6013_v32, %v2891_v49  ;;  %v4864_v49 = vld [vmem:[%s5753_s24 + $0x58] sm:$0xff]  }
 0xd7d   : > { %2896 = vadd.xlane.f32.xlu0 %v2894_v39  ;;  %v4865_v39 = vld [vmem:[%s5753_s24 + $0xd8] sm:$0xff]  }
 0xd7e   : > { %v2895_v52 = vmul.f32 %v6032_v50, %v6032_v50 }
 0xd80   : > { %v2898_v53 = vsel %vm1607_vm0, %v2895_v52, 0.0  ;;  %v4867_v52 = vld [vmem:[%s5753_s24 + $0x98] sm:$0xff]  }
 0xd81   : > { %2899 = vadd.xlane.f32.xlu0 %v2898_v53  ;;  %v4868_v53 = vld [vmem:[%s5753_s24 + $0x60] sm:$0xff]  }
 0xe0a   : > { %v2897_v24 = vpop.xlane.xlu0 %2896 }
 0xe0b   : > { %v2901_v17 = vmul.f32 0.0078125, %v2897_v24 }
 0xe0d   : > { %v2903_v18 = vadd.f32 1e-06, %v2901_v17 }
 0xe0e   : > { %v2900_v13 = vpop.xlane.xlu0 %2899 }
 0xe0f   : > { %4920 = vrsqrt.f32 %v2903_v18  ;;  %v2902_v19 = vmul.f32 0.0078125, %v2900_v13 }
 0xe11   : > { %v2904_v20 = vadd.f32 1e-06, %v2902_v19 }
 0xe13   : > { %4922 = vrsqrt.f32 %v2904_v20 }
 0xe19   : > { %v4921_v22 = vpop.eup %4920 }
 0xe1a   : > { %v2907_v23 = vmul.f32 %v4921_v22, %v6027_v37  ;;  %v4862_v37 = vld [vmem:[%s5753_s24 + $0x10] sm:$0xff]  }
 0xe1c   : > { %v2915_v27 = vmul.f32 %v4155_v25, %v2907_v23 }
 0xe1d   : > { %v4923_v26 = vpop.eup %4922 }
 0xe1e   : > { %v2908_v33 = vmul.f32 %v4923_v26, %v6032_v50  ;;  %v2923_v51 = vadd.f32 %v4156_v28, %v2915_v27  ;;  %v4866_v50 = vld [vmem:[%s5753_s24 + $0x18] sm:$0xff]  }
 0xe20   : > { %v2916_v30 = vmul.f32 %v4155_v25, %v2908_v33 }
 0xe22   : > { %v2924_v31 = vadd.f32 %v4156_v28, %v2916_v30 }
 0xe24   : > { %v2925_v34 = vpack.c.bf16 %v2924_v31, %v2923_v51 }
 0xe26   : > { %3173 = vmatmul.mubr.bf16.vlgmr.msra.gmra.mrb[16].mxu0 %v2925_v34  ;;  %3216 = vmatmul.mubr.bf16.vlgmr.msra.gmra.mrb[12].mxu1 %v2925_v34 }
 0xe27   : > { %4357 = vmatpush3.bf16.msra.mxu0 %v4854_v42  ;;  %4379 = vmatpush3.bf16.msra.mxu1 %v4855_v44 }
 0xe28   : > { %4358 = vmatprep.subr.bf16.mxu0 %v4856_v43  ;;  %4380 = vmatprep.subr.bf16.mxu1 %v4857_v41 }
 0xe2b   : > { %4359 = vmatpush3.bf16.msra.mxu0 %v4858_v45  ;;  %4381 = vmatpush3.bf16.msra.mxu1 %v4859_v46 }
 0xe2c   : > { %4360 = vmatprep.subr.bf16.mxu0 %v4860_v47  ;;  %4382 = vmatprep.subr.bf16.mxu1 %v4861_v48 }
 0xe2f   : > { %4361 = vmatpush3.bf16.msra.mxu0 %v4862_v37  ;;  %4383 = vmatpush3.bf16.msra.mxu1 %v4863_v21 }
 0xe30   : > { %4362 = vmatprep.subr.bf16.mxu0 %v4864_v49  ;;  %4384 = vmatprep.subr.bf16.mxu1 %v4865_v39 }
 0xe33   : > { %4363 = vmatpush3.bf16.msra.mxu0 %v4866_v50  ;;  %4385 = vmatpush3.bf16.msra.mxu1 %v4867_v52 }
 0xe34   : > { %4364 = vmatprep.subr.bf16.mxu0 %v4868_v53  ;;  %4386 = vmatprep.subr.bf16.mxu1 %v4869_v54 }
 0xe37   : > { %4365 = vmatpush3.bf16.msra.mxu0 %v4870_v55  ;;  %4387 = vmatpush3.bf16.msra.mxu1 %v4871_v56 }
 0xe38   : > { %4366 = vmatprep.subr.bf16.mxu0 %v4872_v57  ;;  %4388 = vmatprep.subr.bf16.mxu1 %v4873_v35 }
 0xe3b   : > { %4367 = vmatpush3.bf16.msra.mxu0 %v4874_v58  ;;  %4389 = vmatpush3.bf16.msra.mxu1 %v4875_v59 }
 0xe3c   : > { %4368 = vmatprep.subr.bf16.mxu0 %v4876_v61  ;;  %4390 = vmatprep.subr.bf16.mxu1 %v4877_v62 }
 0xe3f   : > { %4369 = vmatpush3.bf16.msra.mxu0 %v4878_v63  ;;  %4391 = vmatpush3.bf16.msra.mxu1 %v4879_v60 }
 0xe40   : > { %4370 = vmatprep.subr.bf16.mxu0 %v4880_v0  ;;  %4392 = vmatprep.subr.bf16.mxu1 %v4881_v38 }
 0xe43   : > { %4371 = vmatpush3.bf16.msra.mxu0 %v4882_v1  ;;  %4393 = vmatpush3.bf16.msra.mxu1 %v4883_v2 }
 0xef9   : > { %v3174_v9 = vpop.f32.mrb[16].mxu0  ;;  %v3217_v10 = vpop.f32.mrb[12].mxu1 }
 0xefa   : > { %v6113_v16 = vadd.f32 %v3174_v9, %v2963_v5  ;;  %v6115_v24 = vadd.f32 %v3217_v10, %v2971_v6  ;;  %v3176_v17 = vpop.f32.mrb[17].mxu0  ;;  %v3219_v18 = vpop.f32.mrb[13].mxu1 }
 0xefb   : > { %v6117_v13 = vadd.f32 %v3176_v17, %v2967_v7  ;;  %v6119_v19 = vadd.f32 %v3219_v18, %v2975_v8  ;;  %v3178_v12 = vpop.f32.mrb[18].mxu0  ;;  %v3221_v20 = vpop.f32.mrb[14].mxu1 }
 0xefc   : > { %v3234_v14 = vmul.f32 0.044715, %v6113_v16  ;;  %v3236_v11 = vmul.f32 0.044715, %v6115_v24  ;;  %v3179_v15 = vadd.f32 %v3178_v12, %v2963_v5  ;;  %v3222_v22 = vadd.f32 %v3221_v20, %v2971_v6  ;;  %v3180_v23 = vpop.f32.mrb[19].mxu0  ;;  %v3223_v25 = vpop.f32.mrb[15].mxu1 }
 0xefd   : > { %v3235_v26 = vmul.f32 0.044715, %v6117_v13  ;;  %v3237_v33 = vmul.f32 0.044715, %v6119_v19  ;;  %v6125_v27 = vadd.f32 %v3180_v23, %v2967_v7  ;;  %v6127_v28 = vadd.f32 %v3223_v25, %v2975_v8 }
 0xefe   : > { %v3242_v30 = vmul.f32 %v3234_v14, %v6113_v16  ;;  %v3244_v51 = vmul.f32 %v3236_v11, %v6115_v24  ;;  %v3238_v31 = vmul.f32 0.044715, %v3179_v15  ;;  %v3240_v34 = vmul.f32 0.044715, %v3222_v22 }
 0xeff   : > { %v3243_v36 = vmul.f32 %v3235_v26, %v6117_v13  ;;  %v3245_v40 = vmul.f32 %v3237_v33, %v6119_v19  ;;  %v3239_v42 = vmul.f32 0.044715, %v6125_v27  ;;  %v3241_v44 = vmul.f32 0.044715, %v6127_v28 }
 0xf00   : > { %v3250_v43 = vmul.f32 %v3242_v30, %v6113_v16  ;;  %v3252_v41 = vmul.f32 %v3244_v51, %v6115_v24  ;;  %v3246_v45 = vmul.f32 %v3238_v31, %v3179_v15  ;;  %v3248_v46 = vmul.f32 %v3240_v34, %v3222_v22 }
 0xf01   : > { %v3251_v47 = vmul.f32 %v3243_v36, %v6117_v13  ;;  %v3253_v48 = vmul.f32 %v3245_v40, %v6119_v19  ;;  %v3247_v37 = vmul.f32 %v3239_v42, %v6125_v27  ;;  %v3249_v21 = vmul.f32 %v3241_v44, %v6127_v28 }
 0xf02   : > { %v3258_v49 = vadd.f32 %v3250_v43, %v6113_v16  ;;  %v3260_v39 = vadd.f32 %v3252_v41, %v6115_v24  ;;  %v3254_v50 = vmul.f32 %v3246_v45, %v3179_v15  ;;  %v3256_v52 = vmul.f32 %v3248_v46, %v3222_v22 }
 0xf03   : > { %v3255_v53 = vmul.f32 %v3247_v37, %v6125_v27  ;;  %v3257_v54 = vmul.f32 %v3249_v21, %v6127_v28  ;;  %v3259_v58 = vadd.f32 %v3251_v47, %v6117_v13  ;;  %v3261_v63 = vadd.f32 %v3253_v48, %v6119_v19 }
 0xf04   : > { %v3266_v55 = vmul.f32 0.7978846, %v3258_v49  ;;  %v3268_v56 = vmul.f32 0.7978846, %v3260_v39  ;;  %v3262_v57 = vadd.f32 %v3254_v50, %v3179_v15  ;;  %v3264_v35 = vadd.f32 %v3256_v52, %v3222_v22 }
 0xf05   : > { %v3263_v59 = vadd.f32 %v3255_v53, %v6125_v27  ;;  %v3267_v60 = vmul.f32 0.7978846, %v3259_v58  ;;  %v3265_v38 = vadd.f32 %v3257_v54, %v6127_v28  ;;  %v3269_v1 = vmul.f32 0.7978846, %v3261_v63 }
 0xf06   : > { %4924 = vtanh.f32 %v3266_v55  ;;  %v3270_v61 = vmul.f32 0.7978846, %v3262_v57  ;;  %v3272_v62 = vmul.f32 0.7978846, %v3264_v35  ;;  %v3226_v9 = vmul.f32 0.5, %v6113_v16 }
 0xf07   : > { %4926 = vtanh.f32 %v3268_v56  ;;  %v3271_v0 = vmul.f32 0.7978846, %v3263_v59  ;;  %v3273_v2 = vmul.f32 0.7978846, %v3265_v38  ;;  %v3230_v10 = vmul.f32 0.5, %v3179_v15 }
 0xf08   : > { %4928 = vtanh.f32 %v3270_v61  ;;  %v3228_v12 = vmul.f32 0.5, %v6115_v24  ;;  %v3232_v20 = vmul.f32 0.5, %v3222_v22  ;;  %v3227_v23 = vmul.f32 0.5, %v6117_v13 }
 0xf09   : > { %4930 = vtanh.f32 %v3272_v62  ;;  %v3231_v51 = vmul.f32 0.5, %v6125_v27  ;;  %v3229_v15 = vmul.f32 0.5, %v6119_v19  ;;  %v3233_v40 = vmul.f32 0.5, %v6127_v28  ;;  %v4189_v19 = vld [vmem:[%s1046_s21] ss:$0 sm:$0xff]  ;;  %s6364_s21 = sld [smem:[#allocation34_spill]] (!%p4222_p12) }
 0xf0a   : > { %4932 = vtanh.f32 %v3267_v60 }
 0xf0b   : > { %4934 = vtanh.f32 %v3271_v0 }
 0xf0c   : > { %4936 = vtanh.f32 %v3269_v1 }
 0xf0d   : > { %4938 = vtanh.f32 %v3273_v2 }
 0xf10   : > { %v4925_v3 = vpop.eup %4924 }
 0xf11   : > { %v4927_v4 = vpop.eup %4926  ;;  %v3282_v5 = vadd.f32 1.0, %v4925_v3 }
 0xf12   : > { %v4929_v6 = vpop.eup %4928  ;;  %v3284_v7 = vadd.f32 1.0, %v4927_v4 }
 0xf13   : > { %v4931_v8 = vpop.eup %4930  ;;  %v3286_v17 = vadd.f32 1.0, %v4929_v6  ;;  %v3290_v26 = vmul.f32 %v3282_v5, %v3226_v9 }
 0xf14   : > { %v4933_v18 = vpop.eup %4932  ;;  %v3288_v14 = vadd.f32 1.0, %v4931_v8  ;;  %v3292_v34 = vmul.f32 %v3284_v7, %v3228_v12 }
 0xf15   : > { %v4935_v11 = vpop.eup %4934  ;;  %v3283_v25 = vadd.f32 1.0, %v4933_v18  ;;  %v3294_v33 = vmul.f32 %v3286_v17, %v3230_v10 }
 0xf16   : > { %v4937_v30 = vpop.eup %4936  ;;  %v3287_v31 = vadd.f32 1.0, %v4935_v11  ;;  %v3296_v36 = vmul.f32 %v3288_v14, %v3232_v20  ;;  %v4223_v14 = vld [vmem:[%s6364_s21] ss:$0 sm:$0xff] (!%p4222_p12) }
 0xf17   : > { %v4939_v16 = vpop.eup %4938  ;;  %v3285_v24 = vadd.f32 1.0, %v4937_v30  ;;  %v3298_v22 = vpack.c.bf16 %v3294_v33, %v3290_v26  ;;  %v3291_v42 = vmul.f32 %v3283_v25, %v3227_v23  ;;  %v4224_v23 = vld [vmem:[%s6365_s1] ss:$0 sm:$0xff] (!%p4222_p12) }
 0xf18   : > { %v3295_v44 = vmul.f32 %v3287_v31, %v3231_v51  ;;  %v3289_v13 = vadd.f32 1.0, %v4939_v16  ;;  %v3300_v43 = vpack.c.bf16 %v3296_v36, %v3292_v34  ;;  %v4225_v51 = vld [vmem:[#allocation9] ss:$0 sm:$0xff] (!%p4222_p12)  ;;  %v4226_v36 = vld [vmem:[#allocation10] ss:$0 sm:$0xff] (!%p4222_p12) }
 0xf19   : > { %v3293_v45 = vmul.f32 %v3285_v24, %v3229_v15 }
 0xf1a   : > { %v3299_v41 = vpack.c.bf16 %v3295_v44, %v3291_v42  ;;  %v3297_v46 = vmul.f32 %v3289_v13, %v3233_v40  ;;  %v4227_v40 = vld [vmem:[#allocation12] ss:$0 sm:$0xff] (!%p4222_p12)  ;;  %v4228_v42 = vld [vmem:[#allocation13] ss:$0 sm:$0xff] (!%p4222_p12) }
 0xf1c   : > { %3597 = vmatprep.mubr.bf16.mxu0 %v3299_v41  ;;  %v3301_v27 = vpack.c.bf16 %v3297_v46, %v3293_v45 }
 0xf1d   : > { %3598 = vmatmul.mubr.bf16.vlgmr.msra.gmra.mrb[20].mxu0 %v3298_v22 }
 0xf1e   : > { %3638 = vmatprep.mubr.bf16.mxu1 %v3301_v27 }
 0xf1f   : > { %3639 = vmatmul.mubr.bf16.vlgmr.msra.gmra.mrb[16].mxu1 %v3300_v43 }
 0xff0   : > { %v4372_v47 = vpop.f32.mrb[20].mxu0 }
 0xff1   : > { %v4373_v28 = vpop.f32.mrb[21].mxu0 }
 0xff2   : > { %v4394_v48 = vpop.f32.mrb[16].mxu1  ;;  %v4374_v37 = vadd.f32 %v4373_v28, %v4372_v47  ;;  %v4375_v21 = vpop.f32.mrb[22].mxu0 }
 0xff3   : > { %v4395_v49 = vpop.f32.mrb[17].mxu1  ;;  %v4376_v39 = vpop.f32.mrb[23].mxu0 }
 0xff4   : > { %v3600_v50 = vadd.f32 %v4374_v37, %v4189_v19  ;;  %v4396_v52 = vadd.f32 %v4395_v49, %v4394_v48  ;;  %v4397_v53 = vpop.f32.mrb[18].mxu1  ;;  %v4377_v54 = vadd.f32 %v4376_v39, %v4375_v21 }
 0xff5   : > { %v4398_v55 = vpop.f32.mrb[19].mxu1 }
 0xff6   : > { %v3641_v56 = vadd.f32 %v4396_v52, %v3600_v50  ;;  %v3603_v57 = vadd.f32 %v4377_v54, %v4189_v19  ;;  %v4399_v35 = vadd.f32 %v4398_v55, %v4397_v53  ;;  %3654 = sbr.rel (%p4222_p12) target bundleno = 4422 (0x1146), region = 152 }
 0xff8   : > { %v3647_v58 = vadd.f32 %v3641_v56, %v6011_v29  ;;  %v3644_v59 = vadd.f32 %v4399_v35, %v3603_v57 }
 0xffa   : > { %3649 = vst [vmem:[#allocation2] sm:$0xff] %v3647_v58  ;;  %v3648_v61 = vadd.f32 %v3644_v59, %v6013_v32 }
 0xffc   : > { %3650 = vst [vmem:[#allocation2 + $0x8] sm:$0xf] %v3648_v61 }
0x1001   : > { %v3655_v62 = vld [vmem:[#allocation2] ss:$6 sm:$0x3]  ;;  %v3657_v60 = vld [vmem:[#allocation2 + $0x1] ss:$6 sm:$0x3] }
0x1002   : > { %v3661_v63 = vsel %vm3660_vm15, %v3655_v62, 0.0  ;;  %v3705_v0 = vsel %vm3660_vm15, %v3657_v60, 0.0 }
0x1003   : > { %3662 = vadd.xlane.f32.xlu0 %v3661_v63 }
0x1007   : > { %3706 = vadd.xlane.f32.xlu0 %v3705_v0 }
0x1090   : > { %v3663_v38 = vpop.xlane.xlu0 %3662 }
0x1091   : > { %v3664_v1 = vmul.f32 0.0078125, %v3663_v38 }
0x1093   : > { %v3665_v29 = vsub.f32 %v3655_v62, %v3664_v1 }
0x1094   : > { %v3707_v2 = vpop.xlane.xlu0 %3706 }
0x1095   : > { %v3708_v3 = vmul.f32 0.0078125, %v3707_v2  ;;  %v3666_v4 = vmul.f32 %v3665_v29, %v3665_v29 }
0x1097   : > { %v3709_v32 = vsub.f32 %v3657_v60, %v3708_v3  ;;  %v3667_v5 = vsel %vm3660_vm15, %v3666_v4, 0.0 }
0x1098   : > { %3668 = vadd.xlane.f32.xlu1 %v3667_v5 }
0x1099   : > { %v3710_v6 = vmul.f32 %v3709_v32, %v3709_v32 }
0x109b   : > { %v3711_v7 = vsel %vm3660_vm15, %v3710_v6, 0.0 }
0x109c   : > { %3712 = vadd.xlane.f32.xlu1 %v3711_v7 }
0x1125   : > { %v3669_v8 = vpop.xlane.xlu1 %3668 }
0x1126   : > { %v3670_v9 = vmul.f32 0.0078125, %v3669_v8 }
0x1128   : > { %v3671_v10 = vadd.f32 1e-06, %v3670_v9 }
0x1129   : > { %v3713_v17 = vpop.xlane.xlu1 %3712 }
0x112a   : > { %4942 = vrsqrt.f32 %v3671_v10  ;;  %v3714_v18 = vmul.f32 0.0078125, %v3713_v17 }
0x112c   : > { %v3715_v12 = vadd.f32 1e-06, %v3714_v18 }
0x112e   : > { %4944 = vrsqrt.f32 %v3715_v12 }
0x1134   : > { %v4943_v20 = vpop.eup %4942 }
0x1135   : > { %v3673_v11 = vmul.f32 %v4943_v20, %v3665_v29 }
0x1137   : > { %v3680_v25 = vmul.f32 %v4223_v14, %v3673_v11 }
0x1138   : > { %v4945_v26 = vpop.eup %4944 }
0x1139   : > { %v3687_v33 = vadd.f32 %v4224_v23, %v3680_v25  ;;  %v3717_v30 = vmul.f32 %v4945_v26, %v3709_v32 }
0x113b   : > { %v3688_v31 = vmul.f32 0.999995, %v3687_v33  ;;  %v3718_v34 = vmul.f32 %v4223_v14, %v3717_v30 }
0x113d   : > { %v3696_v16 = vmul.f32 %v4225_v51, %v3688_v31  ;;  %v3719_v15 = vadd.f32 %v4224_v23, %v3718_v34 }
0x113f   : > { %v3704_v24 = vadd.f32 %v4226_v36, %v3696_v16  ;;  %v3720_v22 = vmul.f32 0.999995, %v3719_v15 }
0x1141   : > { %3737 = vst [vmem:[#allocation17] sm:$0x3] %v3704_v24  ;;  %3739 = vst [vmem:[#allocation16] sm:$0x3] %v3704_v24  ;;  %v3728_v44 = vmul.f32 %v4227_v40, %v3720_v22 }
0x1143   : > { %v3736_v13 = vadd.f32 %v4228_v42, %v3728_v44 }
0x1145   : > { %3738 = vst [vmem:[#allocation19] sm:$0x3] %v3736_v13  ;;  %3740 = vst [vmem:[#allocation16 + $0x2] sm:$0x3] %v3736_v13 }
0x1146 PF: > { %p4622_p8 = scmp.eq.s32.totalorder %s5459_s29, 1  ;;  %s5300_s19 = smov [#allocation17]  }
0x1147   : > { %s3759_s11 = sshll.u32 %s5300_s19, 4  ;;  %s5301_s4 = smov [#allocation16]   ;;  %s3760_s11 = int_to_ptr.vmem [resolvable:$true] %s3759_s11 }
0x1148   : > { %s3748_s14 = sshll.u32 %s5301_s4, 4  ;;  %s5144_s20 = scalar_lea.vmem %s3760_s11, 32  ;;  %s3749_s14 = int_to_ptr.vmem [resolvable:$true] %s3748_s14 }
0x1149   : > { %p5145_p13 = scmp.ne.s32.totalorder %s3760_s11, %s5144_s20  ;;  %p5151_p0 = scmp.lt.s32.totalorder %s3760_s11, %s3760_s11 }
0x114a   : > { %p5152_p1 = scmp.lt.s32.totalorder %s5144_s20, %s5144_s20 }
0x114b   : > { %p5146_p3 = pnand %p5145_p13, %p4622_p8 }
0x114c   : > { %p5153_p4 = por %p5152_p1, %p5151_p0 }
0x114d   : > { %p5147_p11 = pneg %p5146_p3 }
0x114f   : > { %p5154_p2 = pnand %p5153_p4, %p5147_p11 }
0x1151   : > { %5157 = shalt.err (!%p5154_p2)
}
0x1152   : > { %s6366_s30 = sld [smem:[#allocation50_spill]] }
0x1158   : > { %s5158_s15 = scalar_lea.hbm %s6366_s30, 32 }
0x1159   : > { %p5159_p6 = scmp.ne.s32.totalorder %s6366_s30, %s5158_s15  ;;  %p5164_p10 = scmp.lt.u32.totalorder %s5158_s15, %s6366_s30 }
0x115b   : > { %p5160_p5 = pnand %p5159_p6, %p4622_p8 }
0x115d   : > { %p5161_p9 = pneg %p5160_p5 }
0x115f   : > { %p5166_p7 = pnand %p5164_p10, %p5161_p9 }
0x1161   : > { %5169 = shalt.err (!%p5166_p7)
}
0x1162   : > { %4577 = dma.vmem_to_hbm [thread:$0]  (%p4622_p8), %s3760_s11, 32, %s6366_s30, [#allocation18]  }
0x1163   : > { %s5170_s5 = scalar_lea.vmem %s3749_s14, 64  ;;  %p5177_p11 = scmp.lt.s32.totalorder %s3749_s14, %s3749_s14 }
0x1164   : > { %p5171_p12 = scmp.ne.s32.totalorder %s3749_s14, %s5170_s5  ;;  %p5178_p0 = scmp.lt.s32.totalorder %s5170_s5, %s5170_s5 }
0x1166   : > { %p5172_p13 = pnand %p5171_p12, %p4622_p8  ;;  %p5179_p1 = por %p5178_p0, %p5177_p11 }
0x1168   : > { %p5173_p3 = pneg %p5172_p13 }
0x116a   : > { %p5180_p4 = pnand %p5179_p1, %p5173_p3 }
0x116c   : > { %5183 = shalt.err (!%p5180_p4)
}
0x116d   : > { %s6367_s21 = sld [smem:[#allocation49_spill]] }
0x1173   : > { %s5184_s0 = scalar_lea.hbm %s6367_s21, 64 }
0x1174   : > { %p5185_p2 = scmp.ne.s32.totalorder %s6367_s21, %s5184_s0  ;;  %p5190_p9 = scmp.lt.u32.totalorder %s5184_s0, %s6367_s21 }
0x1176   : > { %p5186_p6 = pnand %p5185_p2, %p4622_p8 }
0x1178   : > { %p5187_p5 = pneg %p5186_p6 }
0x117a   : > { %p5192_p10 = pnand %p5190_p9, %p5187_p5 }
0x117c   : > { %5195 = shalt.err (!%p5192_p10)
}
0x117d   : > { %4575 = dma.vmem_to_hbm [thread:$0]  (%p4622_p8), %s3749_s14, 64, %s6367_s21, [#allocation6]  }
0x117e   : > { %s5302_s22 = smov [#allocation19]  }
0x117f   : > { %s3770_s28 = sshll.u32 %s5302_s22, 4  ;;  %s3771_s28 = int_to_ptr.vmem [resolvable:$true] %s3770_s28 }
0x1180   : > { %s5196_s15 = scalar_lea.vmem %s3771_s28, 32  ;;  %p5203_p3 = scmp.lt.s32.totalorder %s3771_s28, %s3771_s28 }
0x1181   : > { %p5197_p7 = scmp.ne.s32.totalorder %s3771_s28, %s5196_s15  ;;  %p5204_p11 = scmp.lt.s32.totalorder %s5196_s15, %s5196_s15 }
0x1183   : > { %p5198_p12 = pnand %p5197_p7, %p4622_p8  ;;  %p5205_p0 = por %p5204_p11, %p5203_p3 }
0x1185   : > { %p5199_p13 = pneg %p5198_p12 }
0x1187   : > { %p5206_p1 = pnand %p5205_p0, %p5199_p13 }
0x1189   : > { %5209 = shalt.err (!%p5206_p1)
}
0x118a   : > { %s6368_s2 = sld [smem:[#allocation51_spill]] }
0x1190   : > { %s5210_s6 = scalar_lea.hbm %s6368_s2, 32 }
0x1191   : > { %p5211_p4 = scmp.ne.s32.totalorder %s6368_s2, %s5210_s6  ;;  %p5216_p5 = scmp.lt.u32.totalorder %s5210_s6, %s6368_s2 }
0x1193   : > { %p5212_p2 = pnand %p5211_p4, %p4622_p8 }
0x1195   : > { %p5213_p6 = pneg %p5212_p2 }
0x1197   : > { %p5218_p9 = pnand %p5216_p5, %p5213_p6 }
0x1199   : > { %5221 = shalt.err (!%p5218_p9)
}
0x119a   : > { %4579 = dma.vmem_to_hbm [thread:$0]  (%p4622_p8), %s3771_s28, 32, %s6368_s2, [#allocation18]  }
0x119b   : > { %5259 = dma.done.wait (%p4622_p8), [#allocation6], 64  }
0x119c   : > { %5261 = vsyncadd (%p4622_p8), [#allocation6], 4294967232 }
0x119d   : > { %5263 = dma.done.wait (%p4622_p8), [#allocation18], 64  }
0x119e   : > { %5265 = vsyncadd (%p4622_p8), [#allocation18], 4294967232 }
0x119f PF: > { %s6369_s0 = sld [smem:[#allocation27_spill]]  ;;  %p40_p10 = scmp.ge.s32.totalorder %s5614_s9, 4  }
0x11a0   : > { %s6370_s27 = smov %s5272_s3  ;;  %s6371_s3 = smov %s5276_s7 }
0x11a1   : > { %s6373_s28 = smov %s5614_s9  ;;  %42 = sbr.rel (!%p40_p10) target bundleno = 32 (0x20), region = 234 }
0x11a5   : > { %s6372_s7 = smov %s6369_s0 }
0x11a8   :  { %3791 = vsyncpa [#allocation5], 1 }
0x11a9   :  { %3793 = vsyncpa [#allocation5 + $0x1], 1 }
0x11aa   :  { %3794 = vsyncpa [#allocation8], 1 }
0x11ab   :  { %3795 = vsyncpa [#allocation11], 1 }
0x11ac   :  { %3796 = vsyncpa [#allocation14], 1 }
0x11ad   :  { %3797 = vsyncpa [#allocation6], 1 }
0x11ae   :  { %3799 = vsyncpa [#allocation6 + $0x1], 1 }
0x11af   :  { %3800 = vsyncpa [#allocation18], 1 }

</bundles_post_ra>
